<compile_context>
chip_gen: v7x
topology: tpu7x:2x2x1
jax: 0.10.0
libtpu: 0.0.40
codegen_flags: <defaults>
</compile_context>

<pallas_src>
import functools

import jax
import jax.numpy as jnp
from jax import lax
from jax.experimental import pallas as pl
from jax.experimental.pallas import tpu as pltpu


def _coord_conv2d_kernel(x_ref, w_ref, cmap_ref, o_ref, *, kh_size, kw_size):
    # x_ref   : (Bt, H, W, C)      bf16  image block
    # w_ref   : (KH*KW*C, Opad)    bf16  im2col-reshaped image-channel weights
    # cmap_ref: (1, Ho*Wo, Opad)   f32   precomputed coord-channel conv + bias
    # o_ref   : (Bt, Ho*Wo, Opad)  f32
    Bt, H, W, C = x_ref.shape
    _, HoWo, Opad = o_ref.shape
    KH, KW = kh_size, kw_size
    Ho = H - KH + 1
    Wo = W - KW + 1

    x = x_ref[...]                                           # (Bt, H, W, C) bf16

    # im2col patch matrix (static slices, single lane-axis concat).
    taps = []
    for kh in range(KH):                                     # tiny static trip counts
        for kw in range(KW):
            taps.append(x[:, kh:kh + Ho, kw:kw + Wo, :])
    patch = jnp.concatenate(taps, axis=-1)                   # (Bt, Ho, Wo, KH*KW*C)
    patch = patch.reshape(Bt * Ho * Wo, KH * KW * C)

    # One MXU matmul over the full contraction, f32 accumulation.
    acc = jnp.dot(patch, w_ref[...], preferred_element_type=jnp.float32)
    acc = acc.reshape(Bt, HoWo, Opad) + cmap_ref[...]        # coord channels + bias
    o_ref[...] = acc.astype(o_ref.dtype)


def coord_conv2d(x_nchw, weight_oihw, bias, *, stride=1, padding=0):
    """CoordConv2d forward. x: (B, C, H, W); weight: (O, C+2, KH, KW); bias: (O,)."""
    assert stride == 1 and padding == 0  # TODO(synk): general stride/padding/dilation/groups
    B, C, H, W = x_nchw.shape
    O, C2, KH, KW = weight_oihw.shape
    assert C2 == C + 2
    assert H > 1 and W > 1  # TODO(synk): torch's dim_y==dim_x==1 zero-coord special case
    Ho, Wo = H - KH + 1, W - KW + 1

    # Lane-dense output channel count.
    Opad = -(-O // 128) * 128

    # ---- batch-invariant precompute (pure JAX, once per call) -----------------
    # AddCoords rank=2, with_r=False: xx varies along H (/(H-1)), yy along W (/(W-1)).
    xx = jnp.broadcast_to(
        (jnp.arange(H, dtype=jnp.float32) / (H - 1) * 2.0 - 1.0)[:, None], (H, W))
    yy = jnp.broadcast_to(
        (jnp.arange(W, dtype=jnp.float32) / (W - 1) * 2.0 - 1.0)[None, :], (H, W))
    coords = jnp.stack([xx, yy])[None]                          # (1, 2, H, W)
    w_coord = weight_oihw[:, C:, :, :].astype(jnp.float32)      # (O, 2, KH, KW)
    cmap = lax.conv_general_dilated(
        coords, w_coord, window_strides=(1, 1), padding="VALID",
        dimension_numbers=("NCHW", "OIHW", "NCHW"))[0]          # (O, Ho, Wo)
    cmap = jnp.transpose(cmap, (1, 2, 0)) + bias.astype(jnp.float32)[None, None, :]
    cmap = jnp.pad(cmap, ((0, 0), (0, 0), (0, Opad - O)))       # zero-padded lanes
    cmap = cmap.reshape(1, Ho * Wo, Opad)

    # Image-channel weights in im2col layout, zero-padded to Opad, bf16 for the MXU.
    w_in = jnp.transpose(weight_oihw[:, :C, :, :], (2, 3, 1, 0))  # (KH, KW, C, O)
    w_in = w_in.reshape(KH * KW * C, O)
    w_in = jnp.pad(w_in, ((0, 0), (0, Opad - O))).astype(jnp.bfloat16)

    # Activations: NHWC, bf16 (halves HBM traffic into the kernel).
    # TODO(synk): keep the surrounding model NHWC to drop this transpose entirely.
    x = jnp.transpose(x_nchw, (0, 2, 3, 1)).astype(jnp.bfloat16)  # (B, H, W, C)

    # ---- batch tiling: fold several images into the matmul M dim --------------
    bytes_per_img = (H * W * C * 2                    # x block (bf16)
                     + Ho * Wo * KH * KW * C * 2      # im2col patch (bf16)
                     + Ho * Wo * Opad * 4)            # output block (f32)
    budget = 8 * 1024 * 1024   # conservative: fits double-buffered under v7x 64 MiB VMEM
    bt = max(1, min(B, budget // max(bytes_per_img, 1)))
    while B % bt:
        bt -= 1
    # TODO(synk): add Ho-row striping (halo rows) for images too large for one block.

    kernel = functools.partial(_coord_conv2d_kernel, kh_size=KH, kw_size=KW)
    out = pl.pallas_call(
        kernel,
        out_shape=jax.ShapeDtypeStruct((B, Ho * Wo, Opad), jnp.float32),
        grid_spec=pltpu.PrefetchScalarGridSpec(
            num_scalar_prefetch=0,
            grid=(B // bt,),
            in_specs=[
                pl.BlockSpec((bt, H, W, C), lambda bi: (bi, 0, 0, 0)),
                pl.BlockSpec((KH * KW * C, Opad), lambda bi: (0, 0)),
                pl.BlockSpec((1, Ho * Wo, Opad), lambda bi: (0, 0, 0)),
            ],
            out_specs=pl.BlockSpec((bt, Ho * Wo, Opad), lambda bi: (bi, 0, 0)),
        ),
        compiler_params=pltpu.CompilerParams(dimension_semantics=("parallel",)),
    )(x, w_in, cmap)

    out = out[:, :, :O].reshape(B, Ho, Wo, O)
    return jnp.transpose(out, (0, 3, 1, 2))                     # back to NCHW


def ref_coord_conv2d(x_nchw, weight_oihw, bias):
    """Pure-JAX f32 reference matching the PyTorch module (NCHW)."""
    B, C, H, W = x_nchw.shape
    row = jnp.arange(H, dtype=jnp.float32)[:, None] / (H - 1) * 2.0 - 1.0
    col = jnp.arange(W, dtype=jnp.float32)[None, :] / (W - 1) * 2.0 - 1.0
    xx = jnp.broadcast_to(jnp.broadcast_to(row, (H, W))[None, None], (B, 1, H, W))
    yy = jnp.broadcast_to(jnp.broadcast_to(col, (H, W))[None, None], (B, 1, H, W))
    xa = jnp.concatenate([x_nchw, xx, yy], axis=1)
    out = lax.conv_general_dilated(
        xa, weight_oihw, window_strides=(1, 1), padding="VALID",
        dimension_numbers=("NCHW", "OIHW", "NCHW"))
    return out + bias[None, :, None, None]


if __name__ == "__main__":
    key = jax.random.PRNGKey(0)
    B, Cin, H, W = 2, 4, 16, 16
    Cout, K = 8, 3
    C2 = Cin + 2  # rank=2 coord channels, with_r=False

    kx, kw, kb = jax.random.split(key, 3)
    x = jax.random.normal(kx, (B, Cin, H, W), dtype=jnp.float32)

    # Deterministic Conv2d-style init: U(-1/sqrt(fan_in), 1/sqrt(fan_in))
    fan_in = C2 * K * K
    bound = 1.0 / jnp.sqrt(jnp.float32(fan_in))
    weight = jax.random.uniform(kw, (Cout, C2, K, K), jnp.float32, -bound, bound)
    bias = jax.random.uniform(kb, (Cout,), jnp.float32, -bound, bound)

    out = coord_conv2d(x, weight, bias)
    out = jax.block_until_ready(out)

    ref = ref_coord_conv2d(x, weight, bias)
    assert out.shape == (B, Cout, H - K + 1, W - K + 1)
    # bf16 matmul inputs with f32 accumulation -> modest tolerance vs f32 reference.
    assert jnp.allclose(out, ref, atol=3e-2, rtol=3e-2), float(jnp.max(jnp.abs(out - ref)))
    print("KERNEL_OK")
</pallas_src>

<mosaic_0001>
module attributes {stable_mosaic.version = 11 : i64} {
  func.func @_coord_conv2d_kernel(%arg0: i32, %arg1: memref<2x16x16x4xbf16, #tpu.memory_space<vmem>>, %arg2: memref<36x128xbf16, #tpu.memory_space<vmem>>, %arg3: memref<1x196x128xf32, #tpu.memory_space<vmem>>, %arg4: memref<2x196x128xf32, #tpu.memory_space<vmem>>) attributes {dimension_semantics = [#tpu.dimension_semantics<parallel>], iteration_bounds = array<i64: 1>, scalar_prefetch = 0 : i64, scratch_operands = 0 : i64, tpu.core_type = #tpu.core_type<tc>, window_params = [{transform_indices = @transform_0, window_bounds = array<i64: 2, 16, 16, 4>}, {pipeline_mode = #tpu.pipeline_mode<synchronous>, transform_indices = @transform_1, window_bounds = array<i64: 36, 128>}, {pipeline_mode = #tpu.pipeline_mode<synchronous>, transform_indices = @transform_2, window_bounds = array<i64: 1, 196, 128>}, {transform_indices = @transform_3, window_bounds = array<i64: 2, 196, 128>}]} {
    %c0 = arith.constant 0 : index
    %c0_0 = arith.constant 0 : index
    %c0_1 = arith.constant 0 : index
    %c0_2 = arith.constant 0 : index
    %0 = vector.load %arg1[%c0, %c0_0, %c0_1, %c0_2] : memref<2x16x16x4xbf16, #tpu.memory_space<vmem>>, vector<2x16x16x4xbf16>
    %1 = vector.extract_strided_slice %0 {offsets = [0, 0, 0, 0], sizes = [2, 14, 14, 4], strides = [1, 1, 1, 1]} : vector<2x16x16x4xbf16> to vector<2x14x14x4xbf16>
    %2 = vector.extract_strided_slice %0 {offsets = [0, 0, 1, 0], sizes = [2, 14, 14, 4], strides = [1, 1, 1, 1]} : vector<2x16x16x4xbf16> to vector<2x14x14x4xbf16>
    %3 = vector.extract_strided_slice %0 {offsets = [0, 0, 2, 0], sizes = [2, 14, 14, 4], strides = [1, 1, 1, 1]} : vector<2x16x16x4xbf16> to vector<2x14x14x4xbf16>
    %4 = vector.extract_strided_slice %0 {offsets = [0, 1, 0, 0], sizes = [2, 14, 14, 4], strides = [1, 1, 1, 1]} : vector<2x16x16x4xbf16> to vector<2x14x14x4xbf16>
    %5 = vector.extract_strided_slice %0 {offsets = [0, 1, 1, 0], sizes = [2, 14, 14, 4], strides = [1, 1, 1, 1]} : vector<2x16x16x4xbf16> to vector<2x14x14x4xbf16>
    %6 = vector.extract_strided_slice %0 {offsets = [0, 1, 2, 0], sizes = [2, 14, 14, 4], strides = [1, 1, 1, 1]} : vector<2x16x16x4xbf16> to vector<2x14x14x4xbf16>
    %7 = vector.extract_strided_slice %0 {offsets = [0, 2, 0, 0], sizes = [2, 14, 14, 4], strides = [1, 1, 1, 1]} : vector<2x16x16x4xbf16> to vector<2x14x14x4xbf16>
    %8 = vector.extract_strided_slice %0 {offsets = [0, 2, 1, 0], sizes = [2, 14, 14, 4], strides = [1, 1, 1, 1]} : vector<2x16x16x4xbf16> to vector<2x14x14x4xbf16>
    %9 = vector.extract_strided_slice %0 {offsets = [0, 2, 2, 0], sizes = [2, 14, 14, 4], strides = [1, 1, 1, 1]} : vector<2x16x16x4xbf16> to vector<2x14x14x4xbf16>
    %10 = tpu.concatenate %1, %2, %3, %4, %5, %6, %7, %8, %9 in 3 : vector<2x14x14x4xbf16>, vector<2x14x14x4xbf16>, vector<2x14x14x4xbf16>, vector<2x14x14x4xbf16>, vector<2x14x14x4xbf16>, vector<2x14x14x4xbf16>, vector<2x14x14x4xbf16>, vector<2x14x14x4xbf16>, vector<2x14x14x4xbf16> -> vector<2x14x14x36xbf16>
    %11 = vector.shape_cast %10 : vector<2x14x14x36xbf16> to vector<392x36xbf16>
    %c0_3 = arith.constant 0 : index
    %c0_4 = arith.constant 0 : index
    %12 = vector.load %arg2[%c0_3, %c0_4] : memref<36x128xbf16, #tpu.memory_space<vmem>>, vector<36x128xbf16>
    %cst = arith.constant dense<0.000000e+00> : vector<392x128xf32>
    %13 = tpu.matmul %11, %12, %cst {dimension_numbers = #tpu.dot_dimension_numbers<[1], [0], [0], [1], [0, 0, 1, 1], [], []>} : vector<392x36xbf16>, vector<36x128xbf16>, vector<392x128xf32> -> vector<392x128xf32>
    %14 = vector.shape_cast %13 : vector<392x128xf32> to vector<2x196x128xf32>
    %c0_5 = arith.constant 0 : index
    %c0_6 = arith.constant 0 : index
    %c0_7 = arith.constant 0 : index
    %15 = vector.load %arg3[%c0_5, %c0_6, %c0_7] : memref<1x196x128xf32, #tpu.memory_space<vmem>>, vector<1x196x128xf32>
    %16 = vector.broadcast %15 : vector<1x196x128xf32> to vector<2x196x128xf32>
    %17 = arith.addf %14, %16 : vector<2x196x128xf32>
    %c0_8 = arith.constant 0 : index
    %c0_9 = arith.constant 0 : index
    %c0_10 = arith.constant 0 : index
    %18 = vector.load %arg4[%c0_8, %c0_9, %c0_10] : memref<2x196x128xf32, #tpu.memory_space<vmem>>, vector<2x196x128xf32>
    tpu.vector_store %arg4[%c0_8, %c0_9, %c0_10], %17 {strides = array<i32>} : memref<2x196x128xf32, #tpu.memory_space<vmem>>, vector<2x196x128xf32>,
    return
  }
  func.func @transform_0(%arg0: i32) -> (i32, i32, i32, i32) {
    %c0_i32 = arith.constant 0 : i32
    %c0_i32_0 = arith.constant 0 : i32
    %c0_i32_1 = arith.constant 0 : i32
    %c0_i32_2 = arith.constant 0 : i32
    return %arg0, %c0_i32, %c0_i32_0, %c0_i32_1 : i32, i32, i32, i32
  }
  func.func @transform_1(%arg0: i32) -> (i32, i32) {
    %c0_i32 = arith.constant 0 : i32
    %c0_i32_0 = arith.constant 0 : i32
    %c0_i32_1 = arith.constant 0 : i32
    return %c0_i32, %c0_i32_0 : i32, i32
  }
  func.func @transform_2(%arg0: i32) -> (i32, i32, i32) {
    %c0_i32 = arith.constant 0 : i32
    %c0_i32_0 = arith.constant 0 : i32
    %c0_i32_1 = arith.constant 0 : i32
    %c0_i32_2 = arith.constant 0 : i32
    return %c0_i32, %c0_i32_0, %c0_i32_1 : i32, i32, i32
  }
  func.func @transform_3(%arg0: i32) -> (i32, i32, i32) {
    %c0_i32 = arith.constant 0 : i32
    %c0_i32_0 = arith.constant 0 : i32
    %c0_i32_1 = arith.constant 0 : i32
    return %arg0, %c0_i32, %c0_i32_0 : i32, i32, i32
  }
}

</mosaic_0001>

<bundles_post_ra>
// kernel: tpu_custom_call.1
= control target key start
LH: loop header
LB: loop body
LE: loop exit
PB: predicated region body
PF: predicated region fallthrough
CT: control target
= control target key end

     0   :  { %s5206_s26 = smov 4   ;;  %s5207_s10 = smov 8   ;;  %vm4067_vm0 = vcmask 1041408   ;;  %vm5215_vm1 = vmmov 0   ;;  %vm943_vm2 = vcmask 31744   ;;  %vm1000_vm3 = vcmask 64512   ;;  %s7417_s0 = inlined_call_operand.vmem [shape: bf16[2,16,16,4], index: 0, kind: input, shape index: {}]   ;;  %s7418_s1 = inlined_call_operand.vmem [shape: bf16[36,128], index: 1, kind: input, shape index: {}]   ;;  %s7419_s2 = inlined_call_operand.vmem [shape: f32[1,196,128], index: 2, kind: input, shape index: {}]   ;;  %s7420_s3 = inlined_call_operand.vmem [shape: f32[2,196,128], index: 3, kind: output, shape index: {}]  }
   0x1   :  { %v5240_v0 = vld [vmem:[%s7417_s0 + $0x10] sm:$0xff]   ;;  %v5245_v1 = vld [vmem:[%s7417_s0] sm:$0xff]   ;;  %v5254_v6 = vld [vmem:[%s7417_s0 + $0x18] sm:$0xff]   ;;  %s5208_s11 = smov 16   ;;  %s5209_s12 = smov 12   ;;  %vm1057_vm4 = vcmask 97280  }
   0x2   :  { %v234_v2 = vshrl.u32 %v5240_v0, 16  ;;  %v236_v3 = vshll.u32 %v5240_v0, 16  ;;  %v220_v4 = vshrl.u32 %v5245_v1, 16  ;;  %v222_v5 = vshll.u32 %v5245_v1, 16  ;;  %v5259_v7 = vld [vmem:[%s7417_s0 + $0x8] sm:$0xff]   ;;  %v5276_v17 = vld [vmem:[%s7417_s0 + $0x20] sm:$0xff]  }
   0x3   :  { %v5264_v9 = vld [vmem:[%s7417_s0 + $0x28] sm:$0xff]   ;;  %v241_v11 = vshrl.u32 %v5254_v6, 16  ;;  %v243_v12 = vshll.u32 %v5254_v6, 16  ;;  %v227_v14 = vshrl.u32 %v5259_v7, 16  ;;  %v229_v15 = vshll.u32 %v5259_v7, 16  ;;  %v5281_v20 = vld [vmem:[%s7417_s0 + $0x38] sm:$0xff]  }
   0x4   :  { %v238_v8 = vrot.slane %v236_v3, 1  ;;  %v224_v10 = vrot.slane %v222_v5, 1  ;;  %v257_v16 = vshll.u32 %v5264_v9, 16  ;;  %v255_v22 = vshrl.u32 %v5264_v9, 16  ;;  %v5297_v30 = vld [vmem:[%s7417_s0 + $0x30] sm:$0xff]   ;;  %v5124_v32 = vld [vmem:[%s7417_s0 + $0x48] sm:$0xff]  }
   0x5   :  { %v245_v19 = vrot.slane %v243_v12, 1  ;;  %v231_v21 = vrot.slane %v229_v15, 1  ;;  %v250_v24 = vshll.u32 %v5276_v17, 16  ;;  %v248_v26 = vshrl.u32 %v5276_v17, 16  ;;  %v5311_v36 = vld [vmem:[%s7417_s0 + $0x40] sm:$0xff]   ;;  %v5126_v37 = vld [vmem:[%s7417_s0 + $0x58] sm:$0xff]  }
   0x6   :  { %v5268_v13 = vor.u32 %v238_v8, %v234_v2  ;;  %v225_v18 = vor.u32 %v224_v10, %v220_v4  ;;  %v259_v23 = vrot.slane %v257_v16, 1  ;;  %v271_v27 = vshll.u32 %v5281_v20, 16  ;;  %v5127_v44 = vld [vmem:[%s7417_s0 + $0x50] sm:$0xff]   ;;  %v5128_v45 = vld [vmem:[%s7417_s0 + $0x68] sm:$0xff]   ;;  %v5129_v53 = vld [vmem:[%s7417_s0 + $0x60] sm:$0xff]   ;;  %s5210_s13 = smov 20  }
   0x7   :  { %v5288_v25 = vor.u32 %v245_v19, %v241_v11  ;;  %v5292_v28 = vor.u32 %v231_v21, %v227_v14  ;;  %v252_v29 = vrot.slane %v250_v24, 1  ;;  %v269_v31 = vshrl.u32 %v5281_v20, 16  ;;  %v5343_v56 = vld [vmem:[%s7417_s0 + $0x88] sm:$0xff]   ;;  %v5352_v59 = vld [vmem:[%s7417_s0 + $0x80] sm:$0xff]   ;;  %v5361_v5 = vld [vmem:[%s7417_s0 + $0x98] sm:$0xff]   ;;  %s5211_s14 = smov 24  }
   0x8   :  { %419 = vrot.lane.b32.xlu1 %v5268_v13, %s5206_s26  ;;  %415 = vrot.lane.b32.xlu0 %v225_v18, %s5206_s26  ;;  %v5305_v33 = vor.u32 %v259_v23, %v255_v22  ;;  %v273_v34 = vrot.slane %v271_v27, 1  ;;  %v264_v35 = vshll.u32 %v5297_v30, 16  ;;  %v262_v39 = vshrl.u32 %v5297_v30, 16  ;;  %v5376_v15 = vld [vmem:[%s7417_s0 + $0x90] sm:$0xff]   ;;  %v5388_v24 = vld [vmem:[%s7417_s0 + $0xa8] sm:$0xff]   ;;  %s5212_s15 = smov 28  }
   0x9   :  { %v5318_v38 = vor.u32 %v252_v29, %v248_v26  ;;  %v285_v40 = vshll.u32 %v5124_v32, 16  ;;  %v278_v42 = vshll.u32 %v5311_v36, 16  ;;  %v283_v43 = vshrl.u32 %v5124_v32, 16  ;;  %v5393_v26 = vld [vmem:[%s7417_s0 + $0xa0] sm:$0xff]   ;;  %s5214_s18 = smov 32  }
   0xa   :  { %v266_v41 = vrot.slane %v264_v35, 1  ;;  %v5330_v46 = vor.u32 %v273_v34, %v269_v31  ;;  %v299_v48 = vshll.u32 %v5126_v37, 16  ;;  %v276_v50 = vshrl.u32 %v5311_v36, 16  ;;  %v5403_v31 = vld [vmem:[%s7417_s0 + $0xb8] sm:$0xff]  }
   0xb   :  { %v287_v47 = vrot.slane %v285_v40, 1  ;;  %v280_v51 = vrot.slane %v278_v42, 1  ;;  %v292_v52 = vshll.u32 %v5127_v44, 16  ;;  %v297_v54 = vshrl.u32 %v5126_v37, 16 }
   0xc   :  { %421 = vrot.lane.b32.xlu1 %v5288_v25, %s5206_s26  ;;  %417 = vrot.lane.b32.xlu0 %v5292_v28, %s5206_s26  ;;  %v5334_v49 = vor.u32 %v266_v41, %v262_v39  ;;  %v313_v55 = vshll.u32 %v5128_v45, 16  ;;  %v301_v58 = vrot.slane %v299_v48, 1  ;;  %v290_v61 = vshrl.u32 %v5127_v44, 16  ;;  %v5419_v44 = vld [vmem:[%s7417_s0 + $0xb0] sm:$0xff]  }
   0xd   :  { %v5347_v57 = vor.u32 %v287_v47, %v283_v43  ;;  %v5356_v60 = vor.u32 %v280_v51, %v276_v50  ;;  %v294_v62 = vrot.slane %v292_v52, 1  ;;  %v306_v63 = vshll.u32 %v5129_v53, 16 }
   0xe   :  { %v311_v2 = vshrl.u32 %v5128_v45, 16  ;;  %v304_v3 = vshrl.u32 %v5129_v53, 16  ;;  %v315_v4 = vrot.slane %v313_v55, 1  ;;  %v5365_v8 = vor.u32 %v301_v58, %v297_v54  ;;  %v5424_v45 = vld [vmem:[%s7417_s0 + $0xc8] sm:$0xff]  }
   0xf   :  { %v327_v10 = vshll.u32 %v5343_v56, 16  ;;  %v320_v11 = vshll.u32 %v5352_v59, 16  ;;  %v5371_v12 = vor.u32 %v294_v62, %v290_v61  ;;  %v308_v14 = vrot.slane %v306_v63, 1  ;;  %v5441_v62 = vld [vmem:[%s7417_s0 + $0xc0] sm:$0xff]  }
  0x10   :  { %425 = vrot.lane.b32.xlu1 %v5305_v33, %s5206_s26  ;;  %423 = vrot.lane.b32.xlu0 %v5318_v38, %s5206_s26  ;;  %v325_v16 = vshrl.u32 %v5343_v56, 16  ;;  %v318_v18 = vshrl.u32 %v5352_v59, 16  ;;  %v341_v19 = vshll.u32 %v5361_v5, 16  ;;  %v5383_v21 = vor.u32 %v315_v4, %v311_v2 }
  0x11   :  { %v329_v22 = vrot.slane %v327_v10, 1  ;;  %v322_v23 = vrot.slane %v320_v11, 1  ;;  %v5397_v27 = vor.u32 %v308_v14, %v304_v3  ;;  %v334_v29 = vshll.u32 %v5376_v15, 16  ;;  %v5140_v11 = vld [vmem:[%s7417_s0 + $0xd0] sm:$0xff]  }
  0x12   :  { %v339_v32 = vshrl.u32 %v5361_v5, 16  ;;  %v343_v34 = vrot.slane %v341_v19, 1  ;;  %v355_v37 = vshll.u32 %v5388_v24, 16  ;;  %v348_v39 = vshll.u32 %v5393_v26, 16 }
  0x13   :  { %v5408_v35 = vor.u32 %v329_v22, %v325_v16  ;;  %v323_v40 = vor.u32 %v322_v23, %v318_v18  ;;  %v332_v41 = vshrl.u32 %v5376_v15, 16  ;;  %v336_v42 = vrot.slane %v334_v29, 1 }
  0x14   :  { %429 = vrot.lane.b32.xlu1 %v5330_v46, %s5206_s26  ;;  %427 = vrot.lane.b32.xlu0 %v5334_v49, %s5206_s26  ;;  %v369_v43 = vshll.u32 %v5403_v31, 16  ;;  %v5426_v47 = vor.u32 %v343_v34, %v339_v32  ;;  %v353_v48 = vshrl.u32 %v5388_v24, 16  ;;  %v357_v50 = vrot.slane %v355_v37, 1 }
  0x15   :  { %v346_v51 = vshrl.u32 %v5393_v26, 16  ;;  %v350_v52 = vrot.slane %v348_v39, 1  ;;  %v367_v53 = vshrl.u32 %v5403_v31, 16  ;;  %v5434_v54 = vor.u32 %v336_v42, %v332_v41 }
  0x16   :  { %v371_v55 = vrot.slane %v369_v43, 1  ;;  %v362_v58 = vshll.u32 %v5419_v44, 16  ;;  %v383_v61 = vshll.u32 %v5424_v45, 16  ;;  %v5445_v63 = vor.u32 %v357_v50, %v353_v48  ;;  %v5141_v43 = vld [vmem:[%s7418_s1] sm:$0xff]  }
  0x17   :  { %v5449_v2 = vor.u32 %v350_v52, %v346_v51  ;;  %v360_v3 = vshrl.u32 %v5419_v44, 16  ;;  %v376_v10 = vshll.u32 %v5441_v62, 16  ;;  %v381_v16 = vshrl.u32 %v5424_v45, 16  ;;  %v5143_v51 = vld [vmem:[%s7418_s1 + $0x10] ss:$0 sps:$4 sm:$0x33]  }
  0x18   :  { %433 = vrot.lane.b32.xlu1 %v5347_v57, %s5206_s26  ;;  %431 = vrot.lane.b32.xlu0 %v5356_v60, %s5206_s26  ;;  %v364_v4 = vrot.slane %v362_v58, 1  ;;  %v5458_v14 = vor.u32 %v371_v55, %v367_v53  ;;  %v385_v18 = vrot.slane %v383_v61, 1  ;;  %v374_v22 = vshrl.u32 %v5441_v62, 16 }
  0x19   :  { %v378_v23 = vrot.slane %v376_v10, 1  ;;  %v390_v29 = vshll.u32 %v5140_v11, 16  ;;  %v388_v37 = vshrl.u32 %v5140_v11, 16  ;;  %v472_v42 = vrot.slane %v5259_v7, 1 }
  0x1a   :  { %v5463_v19 = vor.u32 %v364_v4, %v360_v3  ;;  %v5468_v32 = vor.u32 %v385_v18, %v381_v16  ;;  %v7421_v48 = vmov 0.0   ;;  %v474_v50 = vrot.slane %v5254_v6, 1 }
  0x1b   :  { %v5472_v34 = vor.u32 %v378_v23, %v374_v22  ;;  %v392_v39 = vrot.slane %v390_v29, 1  ;;  %4993 = vmatprep.subr.bf16.mxu0 %v7421_v48  ;;  %5099 = vmatprep.subr.bf16.mxu1 %v7421_v48  ;;  %v485_v52 = vrot.slane %v5352_v59, 1  ;;  %v4069_v53 = vsel %vm4067_vm0, %v5143_v51, 0 }
  0x1c   :  { %437 = vrot.lane.b32.xlu1 %v5365_v8, %s5206_s26  ;;  %435 = vrot.lane.b32.xlu0 %v5371_v12, %s5206_s26  ;;  %v486_v55 = vrot.slane %v5343_v56, 1  ;;  %v488_v61 = vrot.slane %v5361_v5, 1  ;;  %vm1114_vm5 = vcmask 130048   ;;  %vm1171_vm6 = vcmask 162816  }
  0x1d   :  { %v5479_v41 = vor.u32 %v392_v39, %v388_v37  ;;  %4994 = vmatpush3.bf16.msra.mxu0 %v5141_v43  ;;  %5102 = vmatpush3.bf16.msra.mxu1 %v5141_v43  ;;  %vm1228_vm7 = vcmask 195584   ;;  %vm1285_vm8 = vcmask 228352   ;;  %vm1342_vm9 = vcmask 261120  }
  0x1e   :  { %4995 = vmatprep.subr.bf16.mxu0 %v7421_v48  ;;  %5100 = vmatprep.subr.bf16.mxu1 %v7421_v48  ;;  %vm3991_vm10 = vcmask 293888  }
  0x1f   :  { %4999 = vmatprep.mubr.msk.bf16.mxu0 %vm5215_vm1, %v7421_v48  ;;  %5051 = vmatprep.mubr.msk.bf16.mxu1 %vm5215_vm1, %v7421_v48 }
  0x20   :  { %441 = vrot.lane.b32.xlu1 %v5383_v21, %s5206_s26  ;;  %439 = vrot.lane.b32.xlu0 %v5397_v27, %s5206_s26 }
  0x24   :  { %445 = vrot.lane.b32.xlu1 %v5408_v35, %s5206_s26  ;;  %443 = vrot.lane.b32.xlu0 %v323_v40, %s5206_s26  ;;  %v471_v40 = vrot.slane %v5245_v1, 1 }
  0x28   :  { %449 = vrot.lane.b32.xlu1 %v5426_v47, %s5206_s26  ;;  %447 = vrot.lane.b32.xlu0 %v5434_v54, %s5206_s26 }
  0x2c   :  { %453 = vrot.lane.b32.xlu1 %v5445_v63, %s5206_s26  ;;  %451 = vrot.lane.b32.xlu0 %v5449_v2, %s5206_s26 }
  0x30   :  { %457 = vrot.lane.b32.xlu1 %v5458_v14, %s5206_s26  ;;  %455 = vrot.lane.b32.xlu0 %v5463_v19, %s5206_s26 }
  0x34   :  { %461 = vrot.lane.b32.xlu1 %v5468_v32, %s5206_s26  ;;  %459 = vrot.lane.b32.xlu0 %v5472_v34, %s5206_s26 }
  0x38   :  { %499 = vrot.lane.b32.xlu1 %v471_v40, %s5207_s10  ;;  %463 = vrot.lane.b32.xlu0 %v5479_v41, %s5206_s26 }
  0x3c   :  { %635 = vrot.lane.b32.xlu1 %v5292_v28, %s5208_s11  ;;  %565 = vrot.lane.b32.xlu0 %v5259_v7, %s5209_s12  ;;  %v473_v28 = vrot.slane %v5240_v0, 1 }
  0x40   :  { %501 = vrot.lane.b32.xlu1 %v472_v42, %s5207_s10  ;;  %693 = vrot.lane.b32.xlu0 %v472_v42, %s5210_s13  ;;  %v489_v42 = vrot.slane %v5393_v26, 1 }
  0x44   :  { %567 = vrot.lane.b32.xlu1 %v5240_v0, %s5209_s12  ;;  %759 = vrot.lane.b32.xlu0 %v5240_v0, %s5211_s14 }
  0x48   :  { %637 = vrot.lane.b32.xlu1 %v5268_v13, %s5208_s11  ;;  %829 = vrot.lane.b32.xlu0 %v5268_v13, %s5212_s15  ;;  %v5142_v13 = vld [vmem:[%s7418_s1 + $0x8] sm:$0xff]  }
  0x49   :  { %4996 = vmatpush3.bf16.msra.mxu0 %v5142_v13  ;;  %5103 = vmatpush3.bf16.msra.mxu1 %v5142_v13 }
  0x4a   :  { %4997 = vmatprep.subr.bf16.mxu0 %v7421_v48  ;;  %5101 = vmatprep.subr.bf16.mxu1 %v7421_v48  ;;  %v1431_v48 = vlaneseq }
  0x4c   :  { %695 = vrot.lane.b32.xlu1 %v473_v28, %s5210_s13  ;;  %887 = vrot.lane.b32.xlu0 %v473_v28, %s5214_s18 }
  0x4d   :  { %4998 = vmatpush3.bf16.msra.mxu0 %v4069_v53  ;;  %5104 = vmatpush3.bf16.msra.mxu1 %v4069_v53 }
  0x50   :  { %831 = vrot.lane.b32.xlu1 %v5288_v25, %s5212_s15  ;;  %761 = vrot.lane.b32.xlu0 %v5254_v6, %s5211_s14 }
  0x54   :  { %889 = vrot.lane.b32.xlu1 %v474_v50, %s5214_s18  ;;  %503 = vrot.lane.b32.xlu0 %v473_v28, %s5207_s10 }
  0x58   :  { %527 = vrot.lane.b32.xlu1 %v485_v52, %s5207_s10  ;;  %569 = vrot.lane.b32.xlu0 %v5254_v6, %s5209_s12  ;;  %v487_v6 = vrot.slane %v5376_v15, 1 }
  0x5c   :  { %639 = vrot.lane.b32.xlu1 %v5288_v25, %s5208_s11  ;;  %529 = vrot.lane.b32.xlu0 %v486_v55, %s5207_s10  ;;  %v475_v25 = vrot.slane %v5276_v17, 1 }
  0x60   :  { %595 = vrot.lane.b32.xlu1 %v5376_v15, %s5209_s12  ;;  %593 = vrot.lane.b32.xlu0 %v5343_v56, %s5209_s12 }
  0x64   :  { %663 = vrot.lane.b32.xlu1 %v5408_v35, %s5208_s11  ;;  %697 = vrot.lane.b32.xlu0 %v474_v50, %s5210_s13 }
  0x68   :  { %763 = vrot.lane.b32.xlu1 %v5276_v17, %s5211_s14  ;;  %665 = vrot.lane.b32.xlu0 %v5434_v54, %s5208_s11 }
  0x6c   :  { %723 = vrot.lane.b32.xlu1 %v487_v6, %s5210_s13  ;;  %721 = vrot.lane.b32.xlu0 %v486_v55, %s5210_s13  ;;  %v5659_v55 = vrot.slane %v5388_v24, 1 }
  0x70   :  { %787 = vrot.lane.b32.xlu1 %v5376_v15, %s5211_s14  ;;  %833 = vrot.lane.b32.xlu0 %v5318_v38, %s5212_s15 }
  0x74   :  { %891 = vrot.lane.b32.xlu1 %v475_v25, %s5214_s18  ;;  %789 = vrot.lane.b32.xlu0 %v5361_v5, %s5211_s14 }
  0x78   :  { %859 = vrot.lane.b32.xlu1 %v5426_v47, %s5212_s15  ;;  %857 = vrot.lane.b32.xlu0 %v5434_v54, %s5212_s15 }
  0x7a   :  { %v5562_v35 = vpop.permute.xlu1 %419  ;;  %v5564_v58 = vpop.permute.xlu0 %415 }
  0x7c   :  { %915 = vrot.lane.b32.xlu1 %v487_v6, %s5214_s18  ;;  %505 = vrot.lane.b32.xlu0 %v474_v50, %s5207_s10 }
  0x7e   :  { %v5569_v3 = vpop.permute.xlu1 %421  ;;  %v5571_v4 = vpop.permute.xlu0 %417 }
  0x80   :  { %571 = vrot.lane.b32.xlu1 %v5276_v17, %s5209_s12  ;;  %917 = vrot.lane.b32.xlu0 %v488_v61, %s5214_s18 }
  0x82   :  { %v5576_v54 = vpop.permute.xlu1 %425  ;;  %v5578_v10 = vpop.permute.xlu0 %423 }
  0x84   :  { %641 = vrot.lane.b32.xlu1 %v5318_v38, %s5208_s11  ;;  %531 = vrot.lane.b32.xlu0 %v487_v6, %s5207_s10 }
  0x86   :  { %v5583_v11 = vpop.permute.xlu1 %429  ;;  %v5585_v16 = vpop.permute.xlu0 %427 }
  0x88   :  { %699 = vrot.lane.b32.xlu1 %v475_v25, %s5210_s13  ;;  %597 = vrot.lane.b32.xlu0 %v5361_v5, %s5209_s12 }
  0x8a   :  { %v5590_v17 = vpop.permute.xlu1 %433  ;;  %v5592_v18 = vpop.permute.xlu0 %431 }
  0x8c   :  { %765 = vrot.lane.b32.xlu1 %v5264_v9, %s5211_s14  ;;  %667 = vrot.lane.b32.xlu0 %v5426_v47, %s5208_s11  ;;  %v476_v47 = vrot.slane %v5264_v9, 1 }
  0x8e   :  { %v5598_v38 = vpop.permute.xlu1 %437  ;;  %v5600_v22 = vpop.permute.xlu0 %435 }
  0x8f   :  { %7423 = vst [vmem:[#allocation2_spill] sm:$0xff] %v5598_v38  ;;  %7424 = vst [vmem:[#allocation3_spill] sm:$0xff] %v5600_v22 }
  0x90   :  { %835 = vrot.lane.b32.xlu1 %v5305_v33, %s5212_s15  ;;  %725 = vrot.lane.b32.xlu0 %v488_v61, %s5210_s13 }
  0x92   :  { %v5605_v5 = vpop.permute.xlu1 %441  ;;  %v5607_v23 = vpop.permute.xlu0 %439 }
  0x93   :  { %7425 = vst [vmem:[#allocation4_spill] sm:$0xff] %v5605_v5  ;;  %7426 = vst [vmem:[#allocation5_spill] sm:$0xff] %v5607_v23 }
  0x94   :  { %791 = vrot.lane.b32.xlu1 %v5393_v26, %s5211_s14  ;;  %533 = vrot.lane.b32.xlu0 %v488_v61, %s5207_s10 }
  0x96   :  { %v5613_v29 = vpop.permute.xlu1 %445  ;;  %v5615_v37 = vpop.permute.xlu0 %443 }
  0x98   :  { %599 = vrot.lane.b32.xlu1 %v5393_v26, %s5209_s12  ;;  %893 = vrot.lane.b32.xlu0 %v476_v47, %s5214_s18 }
  0x9a   :  { %v5620_v39 = vpop.permute.xlu1 %449  ;;  %v5622_v40 = vpop.permute.xlu0 %447 }
  0x9c   :  { %507 = vrot.lane.b32.xlu1 %v475_v25, %s5207_s10  ;;  %861 = vrot.lane.b32.xlu0 %v5449_v2, %s5212_s15  ;;  %v5216_v25 = vmov 1966171168  }
  0x9d   :  { %v1429_v61 = vunpack.c.l.s4 %v5216_v25 }
  0x9e   :  { %v5628_v28 = vpop.permute.xlu1 %453  ;;  %v5630_v43 = vpop.permute.xlu0 %451 }
  0x9f   :  { %v1430_v25 = vunpack.c.0.s8 %v1429_v61 }
  0xa0   :  { %919 = vrot.lane.b32.xlu1 %v489_v42, %s5214_s18  ;;  %669 = vrot.lane.b32.xlu0 %v5449_v2, %s5208_s11 }
  0xa2   :  { %v5635_v13 = vpop.permute.xlu1 %457  ;;  %v5637_v50 = vpop.permute.xlu0 %455 }
  0xa4   :  { %727 = vrot.lane.b32.xlu1 %v489_v42, %s5210_s13  ;;  %573 = vrot.lane.b32.xlu0 %v5264_v9, %s5209_s12 }
  0xa6   :  { %v5642_v26 = vpop.permute.xlu1 %461  ;;  %v5644_v51 = vpop.permute.xlu0 %459 }
  0xa7   :  { %7427 = vst [vmem:[#allocation6_spill] sm:$0xff] %v5642_v26  ;;  %7428 = vst [vmem:[#allocation7_spill] sm:$0xff] %v5644_v51  ;;  %v1432_v26 = vshrl.u32 %v1431_v48, 7 }
  0xa8   :  { %793 = vrot.lane.b32.xlu1 %v5388_v24, %s5211_s14  ;;  %643 = vrot.lane.b32.xlu0 %v5305_v33, %s5208_s11 }
  0xaa   :  { %v500_v2 = vpop.permute.xlu1 %499  ;;  %v5650_v52 = vpop.permute.xlu0 %463 }
  0xab   :  { %7429 = vst [vmem:[#allocation8_spill] sm:$0xff] %v5650_v52 }
  0xac   :  { %863 = vrot.lane.b32.xlu1 %v5445_v63, %s5212_s15  ;;  %701 = vrot.lane.b32.xlu0 %v476_v47, %s5210_s13 }
  0xae   :  { %v636_v53 = vpop.permute.xlu1 %635  ;;  %v566_v9 = vpop.permute.xlu0 %565 }
  0xb0   :  { %767 = vrot.lane.b32.xlu1 %v5297_v30, %s5211_s14  ;;  %535 = vrot.lane.b32.xlu0 %v489_v42, %s5207_s10  ;;  %v945_v42 = vsel %vm943_vm2, %v5245_v1, %v5564_v58 }
  0xb1   :  { %v1002_v52 = vsel %vm1000_vm3, %v945_v42, %v500_v2  ;;  %v5682_v2 = vsub.s32 %v1430_v25, %v1432_v26 }
  0xb2   :  { %v502_v6 = vpop.permute.xlu1 %501  ;;  %v694_v33 = vpop.permute.xlu0 %693  ;;  %v1059_v38 = vsel %vm1057_vm4, %v1002_v52, %v566_v9  ;;  %v947_v9 = vsel %vm943_vm2, %v5259_v7, %v5571_v4 }
  0xb3   :  { %v1116_v58 = vsel %vm1114_vm5, %v1059_v38, %v636_v53  ;;  %v1004_v61 = vsel %vm1000_vm3, %v947_v9, %v502_v6 }
  0xb4   :  { %601 = vrot.lane.b32.xlu1 %v5388_v24, %s5209_s12  ;;  %921 = vrot.lane.b32.xlu0 %v5659_v55, %s5214_s18  ;;  %v5671_v24 = vrot.slane %v5297_v30, 1 }
  0xb6   :  { %v568_v5 = vpop.permute.xlu1 %567  ;;  %v760_v23 = vpop.permute.xlu0 %759 }
  0xb8   :  { %509 = vrot.lane.b32.xlu1 %v476_v47, %s5207_s10  ;;  %837 = vrot.lane.b32.xlu0 %v5334_v49, %s5212_s15  ;;  %v1173_v47 = vsel %vm1171_vm6, %v1116_v58, %v694_v33 }
  0xb9   :  { %v1230_v48 = vsel %vm1228_vm7, %v1173_v47, %v760_v23 }
  0xba   :  { %v638_v22 = vpop.permute.xlu1 %637  ;;  %v830_v1 = vpop.permute.xlu0 %829 }
  0xbb   :  { %v1287_v38 = vsel %vm1285_vm8, %v1230_v48, %v830_v1 }
  0xbc   :  { %895 = vrot.lane.b32.xlu1 %v5671_v24, %s5214_s18  ;;  %671 = vrot.lane.b32.xlu0 %v5445_v63, %s5208_s11  ;;  %v1061_v63 = vsel %vm1057_vm4, %v1004_v61, %v568_v5 }
  0xbd   :  { %v1118_v7 = vsel %vm1114_vm5, %v1061_v63, %v638_v22 }
  0xbe   :  { %v696_v52 = vpop.permute.xlu1 %695  ;;  %v888_v53 = vpop.permute.xlu0 %887 }
  0xbf   :  { %v1344_v33 = vsel %vm1342_vm9, %v1287_v38, %v888_v53  ;;  %v1175_v42 = vsel %vm1171_vm6, %v1118_v7, %v696_v52 }
  0xc0   :  { %729 = vrot.lane.b32.xlu1 %v5659_v55, %s5210_s13  ;;  %v1427_v26 = vcombine.high %v1344_v33, %v1344_v33  ;;  %v1434_v23 = vrot.slane %v1344_v33, %v5682_v2  ;;  %575 = vrot.lane.b32.xlu0 %v5297_v30, %s5209_s12 }
  0xc2   :  { %v832_v4 = vpop.permute.xlu1 %831  ;;  %v1441_v6 = vrot.slane %v1427_v26, %v5682_v2  ;;  %v1442_v25 = vcombine.high %v1434_v23, %v1434_v23  ;;  %v762_v1 = vpop.permute.xlu0 %761  ;;  %v1450_v47 = vrot.slane %v1434_v23, %v5682_v2  ;;  %v5715_v26 = vrot.slane %v5419_v44, 1 }
  0xc3   :  { %v1232_v58 = vsel %vm1228_vm7, %v1175_v42, %v762_v1 }
  0xc4   :  { %795 = vrot.lane.b32.xlu1 %v5419_v44, %s5211_s14  ;;  %v1443_v5 = vcombine.high %v1441_v6, %v1441_v6  ;;  %v1464_v48 = vrot.slane %v1442_v25, %v5682_v2  ;;  %645 = vrot.lane.b32.xlu0 %v5334_v49, %s5208_s11  ;;  %v1457_v30 = vrot.slane %v1441_v6, %v5682_v2 }
  0xc5   :  { %v1289_v52 = vsel %vm1285_vm8, %v1232_v58, %v832_v4 }
  0xc6   :  { %v890_v22 = vpop.permute.xlu1 %889  ;;  %v1471_v9 = vrot.slane %v1443_v5, %v5682_v2  ;;  %v2776_v38 = vcombine.low %v1450_v47, %v1464_v48  ;;  %v4923_v53 = vcombine.high %v1450_v47, %v1464_v48  ;;  %v504_v33 = vpop.permute.xlu0 %503  ;;  %v1473_v6 = vcombine.high %v1457_v30, %v1457_v30 }
  0xc7   :  { %v1346_v61 = vsel %vm1342_vm9, %v1289_v52, %v890_v22  ;;  %v5740_v52 = vrot.slane %v5281_v20, 1 }
  0xc8   :  { %v1482_v63 = vrot.slane %v1346_v61, %v5682_v2  ;;  %865 = vrot.lane.b32.xlu1 %v5463_v19, %s5212_s15  ;;  %703 = vrot.lane.b32.xlu0 %v5671_v24, %s5210_s13  ;;  %v2778_v7 = vcombine.low %v1457_v30, %v1471_v9  ;;  %v2786_v4 = vrot.slane %v2776_v38, %v5682_v2 }
  0xc9   :  { %v2793_v42 = vrot.slane %v4923_v53, %v5682_v2 }
  0xca   :  { %v5720_v49 = vrot.slane %v1482_v63, %v5682_v2  ;;  %v5722_v23 = vpop.permute.xlu1 %527  ;;  %v570_v25 = vpop.permute.xlu0 %569  ;;  %v2800_v5 = vrot.slane %v2778_v7, %v5682_v2 }
  0xcb   :  { %v2808_v47 = vcombine.low %v2786_v4, %v2793_v42 }
  0xcc   :  { %923 = vrot.lane.b32.xlu1 %v5715_v26, %s5214_s18  ;;  %v2779_v1 = vcombine.low %v1473_v6, %v5720_v49  ;;  %769 = vrot.lane.b32.xlu0 %v5281_v20, %s5211_s14  ;;  %v7430_v6 = vmov 0.0  }
  0xcd   :  { %v2816_v53 = vrot.slane %v2808_v47, %v5682_v2 }
  0xce   :  { %v640_v58 = vpop.permute.xlu1 %639  ;;  %v2807_v48 = vrot.slane %v2779_v1, %v5682_v2  ;;  %v5733_v22 = vpop.permute.xlu0 %529 }
  0xd0   :  { %537 = vrot.lane.b32.xlu1 %v5659_v55, %s5207_s10  ;;  %v2809_v30 = vcombine.low %v2800_v5, %v2807_v48  ;;  %839 = vrot.lane.b32.xlu0 %v5330_v46, %s5212_s15  ;;  %v1475_v5 = vcombine.high %v1346_v61, %v1346_v61 }
  0xd2   :  { %v5742_v9 = vpop.permute.xlu1 %595  ;;  %v594_v38 = vpop.permute.xlu0 %593  ;;  %v2823_v7 = vrot.slane %v2809_v30, %v5682_v2  ;;  %v1490_v30 = vcombine.high %v1482_v63, %v1482_v63 }
  0xd4   :  { %603 = vrot.lane.b32.xlu1 %v5419_v44, %s5209_s12  ;;  %897 = vrot.lane.b32.xlu0 %v5740_v52, %s5214_s18  ;;  %v2824_v55 = vcombine.low %v2816_v53, %v2823_v7  ;;  %v1512_v51 = vrot.slane %v1490_v30, %v5682_v2 }
  0xd6   :  { %v664_v4 = vpop.permute.xlu1 %663  ;;  %5000 = vmatmul.mubr.msk.bf16.vlgmr.msra.gmra.mrb[0].mxu0 %vm3991_vm10, %v2824_v55  ;;  %v698_v42 = vpop.permute.xlu0 %697  ;;  %v1522_v30 = vcombine.high %v1512_v51, %v1512_v51 }
  0xd7   :  { %5003 = vmatprep.mubr.msk.bf16.mxu0 %vm5215_vm1, %v7430_v6 }
  0xd8   :  { %673 = vrot.lane.b32.xlu1 %v5463_v19, %s5208_s11  ;;  %511 = vrot.lane.b32.xlu0 %v5671_v24, %s5207_s10  ;;  %v949_v19 = vsel %vm943_vm2, %v5240_v0, %v5562_v35  ;;  %v1489_v24 = vrot.slane %v1475_v5, %v5682_v2  ;;  %v5777_v35 = vrot.slane %v5403_v31, 1 }
  0xd9   :  { %v1006_v53 = vsel %vm1000_vm3, %v949_v19, %v504_v33  ;;  %v973_v19 = vsel %vm943_vm2, %v5352_v59, %v5615_v37 }
  0xda   :  { %v764_v1 = vpop.permute.xlu1 %763  ;;  %v666_v44 = vpop.permute.xlu0 %665  ;;  %v1063_v61 = vsel %vm1057_vm4, %v1006_v53, %v570_v25  ;;  %v1491_v33 = vcombine.high %v1489_v24, %v1489_v24  ;;  %v1505_v63 = vrot.slane %v1489_v24, %v5682_v2 }
  0xdb   :  { %v1120_v7 = vsel %vm1114_vm5, %v1063_v61, %v640_v58  ;;  %v1030_v61 = vsel %vm1000_vm3, %v973_v19, %v5722_v23 }
  0xdc   :  { %731 = vrot.lane.b32.xlu1 %v5715_v26, %s5210_s13  ;;  %577 = vrot.lane.b32.xlu0 %v5281_v20, %s5209_s12  ;;  %v1177_v0 = vsel %vm1171_vm6, %v1120_v7, %v698_v42  ;;  %v1521_v53 = vcombine.high %v1505_v63, %v1505_v63  ;;  %v1520_v7 = vcombine.high %v5720_v49, %v5720_v49 }
  0xdd   :  { %v1087_v59 = vsel %vm1057_vm4, %v1030_v61, %v594_v38  ;;  %v975_v49 = vsel %vm943_vm2, %v5343_v56, %v5613_v29 }
  0xde   :  { %v724_v47 = vpop.permute.xlu1 %723  ;;  %v722_v48 = vpop.permute.xlu0 %721  ;;  %v1032_v19 = vsel %vm1000_vm3, %v975_v49, %v5733_v22 }
  0xdf   :  { %v1089_v56 = vsel %vm1057_vm4, %v1032_v19, %v5742_v9 }
  0xe0   :  { %797 = vrot.lane.b32.xlu1 %v5403_v31, %s5211_s14  ;;  %647 = vrot.lane.b32.xlu0 %v5330_v46, %s5208_s11  ;;  %v1234_v46 = vsel %vm1228_vm7, %v1177_v0, %v764_v1  ;;  %v1519_v1 = vrot.slane %v1491_v33, %v5682_v2  ;;  %v1144_v0 = vsel %vm1114_vm5, %v1087_v59, %v664_v4 }
  0xe1   :  { %v1201_v33 = vsel %vm1171_vm6, %v1144_v0, %v722_v48  ;;  %v5819_v48 = vrot.slane %v5311_v36, 1 }
  0xe2   :  { %v788_v20 = vpop.permute.xlu1 %787  ;;  %v834_v55 = vpop.permute.xlu0 %833  ;;  %v2827_v38 = vcombine.low %v1519_v1, %v1521_v53 }
  0xe3   :  { %v1291_v25 = vsel %vm1285_vm8, %v1234_v46, %v834_v55  ;;  %v1258_v4 = vsel %vm1228_vm7, %v1201_v33, %v788_v20 }
  0xe4   :  { %867 = vrot.lane.b32.xlu1 %v5458_v14, %s5212_s15  ;;  %705 = vrot.lane.b32.xlu0 %v5740_v52, %s5210_s13 }
  0xe6   :  { %v892_v58 = vpop.permute.xlu1 %891  ;;  %v790_v42 = vpop.permute.xlu0 %789 }
  0xe7   :  { %v5785_v5 = vsel %vm1342_vm9, %v1291_v25, %v892_v58  ;;  %v2826_v25 = vcombine.low %v1522_v30, %v1505_v63  ;;  %v2825_v63 = vcombine.low %v1512_v51, %v1520_v7  ;;  %v1146_v51 = vsel %vm1114_vm5, %v1089_v56, %v666_v44 }
  0xe8   :  { %v1530_v24 = vrot.slane %v5785_v5, %v5682_v2  ;;  %925 = vrot.lane.b32.xlu1 %v5777_v35, %s5214_s18  ;;  %771 = vrot.lane.b32.xlu0 %v5311_v36, %s5211_s14  ;;  %v1203_v61 = vsel %vm1171_vm6, %v1146_v51, %v724_v47  ;;  %v2849_v7 = vrot.slane %v2827_v38, %v5682_v2 }
  0xe9   :  { %v2842_v1 = vrot.slane %v2826_v25, %v5682_v2  ;;  %v2835_v59 = vrot.slane %v2825_v63, %v5682_v2 }
  0xea   :  { %v1538_v37 = vcombine.high %v1530_v24, %v1530_v24  ;;  %v860_v55 = vpop.permute.xlu1 %859  ;;  %v858_v46 = vpop.permute.xlu0 %857  ;;  %v5805_v58 = vrot.slane %v1530_v24, %v5682_v2 }
  0xeb   :  { %v1315_v30 = vsel %vm1285_vm8, %v1258_v4, %v858_v46  ;;  %v2857_v4 = vcombine.low %v2835_v59, %v2842_v1 }
  0xec   :  { %v5808_v23 = vrot.slane %v1538_v37, %v5682_v2  ;;  %539 = vrot.lane.b32.xlu1 %v5715_v26, %s5207_s10  ;;  %841 = vrot.lane.b32.xlu0 %v5356_v60, %s5212_s15  ;;  %v1260_v37 = vsel %vm1228_vm7, %v1203_v61, %v790_v42 }
  0xee   :  { %v2828_v26 = vcombine.low %v5805_v58, %v5808_v23  ;;  %v916_v24 = vpop.permute.xlu1 %915  ;;  %v5829_v20 = vpop.permute.xlu0 %505 }
  0xef   :  { %v1372_v29 = vsel %vm1342_vm9, %v1315_v30, %v916_v24 }
  0xf0   :  { %v2856_v53 = vrot.slane %v2828_v26, %v5682_v2  ;;  %v2099_v22 = vcombine.high %v1372_v29, %v1372_v29  ;;  %605 = vrot.lane.b32.xlu1 %v5403_v31, %s5209_s12  ;;  %v2106_v9 = vrot.slane %v1372_v29, %v5682_v2  ;;  %899 = vrot.lane.b32.xlu0 %v5819_v48, %s5214_s18 }
  0xf1   :  { %v1317_v31 = vsel %vm1285_vm8, %v1260_v37, %v860_v55 }
  0xf2   :  { %v2113_v44 = vrot.slane %v2099_v22, %v5682_v2  ;;  %v5844_v0 = vpop.permute.xlu1 %571  ;;  %v2858_v46 = vcombine.low %v2849_v7, %v2856_v53  ;;  %v2114_v25 = vcombine.high %v2106_v9, %v2106_v9  ;;  %v918_v47 = vpop.permute.xlu0 %917  ;;  %v5852_v42 = vrot.slane %v2106_v9, %v5682_v2 }
  0xf3   :  { %v1374_v38 = vsel %vm1342_vm9, %v1317_v31, %v918_v47  ;;  %v2865_v9 = vrot.slane %v2857_v4, %v5682_v2  ;;  %v1523_v4 = vcombine.high %v5785_v5, %v5785_v5 }
  0xf4   :  { %v2115_v33 = vcombine.high %v2113_v44, %v2113_v44  ;;  %v2129_v49 = vrot.slane %v2113_v44, %v5682_v2  ;;  %675 = vrot.lane.b32.xlu1 %v5458_v14, %s5208_s11  ;;  %v5855_v63 = vrot.slane %v2114_v25, %v5682_v2  ;;  %v2147_v19 = vcombine.high %v1374_v38, %v1374_v38 }
  0xf5   :  { %v2154_v55 = vrot.slane %v1374_v38, %v5682_v2  ;;  %513 = vrot.lane.b32.xlu0 %v5740_v52, %s5207_s10  ;;  %v2872_v51 = vrot.slane %v2858_v46, %v5682_v2 }
  0xf6   :  { %v2143_v26 = vrot.slane %v2115_v33, %v5682_v2  ;;  %v2145_v30 = vcombine.high %v2129_v49, %v2129_v49  ;;  %v642_v24 = vpop.permute.xlu1 %641  ;;  %v4930_v14 = vcombine.high %v5852_v42, %v5855_v63  ;;  %v2161_v56 = vrot.slane %v2147_v19, %v5682_v2  ;;  %v5864_v1 = vpop.permute.xlu0 %531 }
  0xf7   :  { %v2162_v29 = vcombine.high %v2154_v55, %v2154_v55  ;;  %v2170_v22 = vrot.slane %v2154_v55, %v5682_v2  ;;  %v2873_v33 = vcombine.low %v2865_v9, %v2872_v51  ;;  %v5909_v9 = vld [vmem:[%s7417_s0 + $0x48] sm:$0xff]  }
  0xf8   :  { %v3367_v53 = vcombine.low %v2129_v49, %v2143_v26  ;;  %733 = vrot.lane.b32.xlu1 %v5777_v35, %s5210_s13  ;;  %v5871_v52 = vrot.slane %v4930_v14, %v5682_v2  ;;  %v2163_v61 = vcombine.high %v2161_v56, %v2161_v56  ;;  %v2177_v7 = vrot.slane %v2161_v56, %v5682_v2 }
  0xf9   :  { %579 = vrot.lane.b32.xlu0 %v5311_v36, %s5209_s12  ;;  %v2184_v37 = vrot.slane %v2162_v29, %v5682_v2  ;;  %v2192_v44 = vcombine.high %v2170_v22, %v2170_v22  ;;  %v3413_v46 = vcombine.low %v2145_v30, %v2170_v22  ;;  %5004 = vmatmul.mubr.msk.bf16.gmra.mrb[4].mxu0 %vm3991_vm10, %v2873_v33  ;;  %v5923_v33 = vrot.slane %v5441_v62, 1 }
  0xfa   :  { %v5878_v59 = vrot.slane %v3367_v53, %v5682_v2  ;;  %v700_v31 = vpop.permute.xlu1 %699  ;;  %v2191_v25 = vrot.slane %v2163_v61, %v5682_v2  ;;  %v2193_v47 = vcombine.high %v2177_v7, %v2177_v7  ;;  %v5882_v49 = vpop.permute.xlu0 %597  ;;  %5007 = vmatprep.mubr.msk.bf16.mxu0 %vm5215_vm1, %v7430_v6 }
  0xfb   :  { %v2194_v36 = vcombine.high %v2184_v37, %v2184_v37  ;;  %v3414_v19 = vcombine.low %v2184_v37, %v2192_v44  ;;  %v3423_v30 = vrot.slane %v3413_v46, %v5682_v2  ;;  %v5176_v46 = vld [vmem:[%s7417_s0 + $0x18] sm:$0xff]  }
  0xfc   :  { %v3397_v38 = vcombine.low %v5871_v52, %v5878_v59  ;;  %799 = vrot.lane.b32.xlu1 %v5441_v62, %s5211_s14  ;;  %v3416_v55 = vcombine.low %v2191_v25, %v2193_v47  ;;  %v951_v25 = vsel %vm943_vm2, %v5176_v46, %v5569_v3 }
  0xfd   :  { %649 = vrot.lane.b32.xlu0 %v5356_v60, %s5208_s11  ;;  %v3415_v26 = vcombine.low %v2194_v36, %v2177_v7  ;;  %v3430_v14 = vrot.slane %v3414_v19, %v5682_v2  ;;  %v1537_v60 = vrot.slane %v1523_v4, %v5682_v2  ;;  %v1008_v36 = vsel %vm1000_vm3, %v951_v25, %v5829_v20 }
  0xfe   :  { %v766_v56 = vpop.permute.xlu1 %765  ;;  %v3444_v29 = vrot.slane %v3416_v55, %v5682_v2  ;;  %v5898_v51 = vpop.permute.xlu0 %667  ;;  %v1065_v55 = vsel %vm1057_vm4, %v1008_v36, %v5844_v0 }
  0xff   :  { %v3437_v5 = vrot.slane %v3415_v26, %v5682_v2  ;;  %v3445_v53 = vcombine.low %v3423_v30, %v3430_v14  ;;  %v1539_v47 = vcombine.high %v1537_v60, %v1537_v60  ;;  %v1122_v30 = vsel %vm1114_vm5, %v1065_v55, %v642_v24 }
 0x100   :  { %869 = vrot.lane.b32.xlu1 %v5472_v34, %s5212_s15  ;;  %v1553_v24 = vrot.slane %v1537_v60, %v5682_v2  ;;  %v4924_v60 = vcombine.high %v5805_v58, %v5808_v23  ;;  %v977_v58 = vsel %vm943_vm2, %v5376_v15, %v5622_v40 }
 0x101   :  { %707 = vrot.lane.b32.xlu0 %v5819_v48, %s5210_s13  ;;  %v3446_v61 = vcombine.low %v3437_v5, %v3444_v29  ;;  %v3453_v37 = vrot.slane %v3445_v53, %v5682_v2  ;;  %v1567_v3 = vrot.slane %v1539_v47, %v5682_v2 }
 0x102   :  { %v836_v22 = vpop.permute.xlu1 %835  ;;  %v726_v7 = vpop.permute.xlu0 %725  ;;  %v2884_v36 = vrot.slane %v4924_v60, %v5682_v2 }
 0x103   :  { %v3460_v44 = vrot.slane %v3446_v61, %v5682_v2 }
 0x104   :  { %773 = vrot.lane.b32.xlu1 %v5909_v9, %s5211_s14 }
 0x105   :  { %541 = vrot.lane.b32.xlu0 %v5777_v35, %s5207_s10  ;;  %v3461_v4 = vcombine.low %v3453_v37, %v3460_v44  ;;  %v1179_v35 = vsel %vm1171_vm6, %v1122_v30, %v700_v31  ;;  %v2875_v31 = vcombine.low %v1553_v24, %v1567_v3  ;;  %v1569_v44 = vcombine.high %v1553_v24, %v1553_v24 }
 0x106   :  { %v792_v19 = vpop.permute.xlu1 %791  ;;  %v5929_v26 = vpop.permute.xlu0 %533  ;;  %v1236_v20 = vsel %vm1228_vm7, %v1179_v35, %v766_v56  ;;  %v480_v56 = vrot.slane %v5909_v9, 1 }
 0x107   :  { %5052 = vmatmul.mubr.msk.bf16.vlgmr.msra.gmra.mrb[0].mxu1 %vm3991_vm10, %v3461_v4  ;;  %v1293_v14 = vsel %vm1285_vm8, %v1236_v20, %v836_v22  ;;  %v1034_v4 = vsel %vm1000_vm3, %v977_v58, %v5864_v1 }
 0x108   :  { %607 = vrot.lane.b32.xlu1 %v5441_v62, %s5209_s12  ;;  %5055 = vmatprep.mubr.msk.bf16.mxu1 %vm5215_vm1, %v7430_v6  ;;  %v1091_v3 = vsel %vm1057_vm4, %v1034_v4, %v5882_v49 }
 0x109   :  { %927 = vrot.lane.b32.xlu0 %v5923_v33, %s5214_s18  ;;  %v1148_v15 = vsel %vm1114_vm5, %v1091_v3, %v5898_v51  ;;  %v5991_v51 = vrot.slane %v5424_v45, 1 }
 0x10a   :  { %v5942_v0 = vpop.permute.xlu1 %599  ;;  %v894_v29 = vpop.permute.xlu0 %893  ;;  %v1205_v1 = vsel %vm1171_vm6, %v1148_v15, %v726_v7 }
 0x10b   :  { %v5947_v62 = vsel %vm1342_vm9, %v1293_v14, %v894_v29  ;;  %v1262_v14 = vsel %vm1228_vm7, %v1205_v1, %v792_v19 }
 0x10c   :  { %677 = vrot.lane.b32.xlu1 %v5472_v34, %s5208_s11  ;;  %v1578_v5 = vrot.slane %v5947_v62, %v5682_v2  ;;  %v2891_v34 = vrot.slane %v2875_v31, %v5682_v2 }
 0x10d   :  { %843 = vrot.lane.b32.xlu0 %v5347_v57, %s5212_s15 }
 0x10e   :  { %v5956_v53 = vpop.permute.xlu1 %507  ;;  %v1586_v22 = vcombine.high %v1578_v5, %v1578_v5  ;;  %v1594_v61 = vrot.slane %v1578_v5, %v5682_v2  ;;  %v862_v37 = vpop.permute.xlu0 %861  ;;  %v2906_v35 = vcombine.low %v2884_v36, %v2891_v34 }
 0x10f   :  { %v1319_v31 = vsel %vm1285_vm8, %v1262_v14, %v862_v37 }
 0x110   :  { %735 = vrot.lane.b32.xlu1 %v5923_v33, %s5210_s13  ;;  %v5965_v46 = vrot.slane %v1586_v22, %v5682_v2  ;;  %v1616_v25 = vcombine.high %v1594_v61, %v1594_v61  ;;  %v2876_v23 = vcombine.low %v1569_v44, %v1594_v61 }
 0x111   :  { %901 = vrot.lane.b32.xlu0 %v480_v56, %s5214_s18 }
 0x112   :  { %v920_v47 = vpop.permute.xlu1 %919  ;;  %v2877_v55 = vcombine.low %v5965_v46, %v1616_v25  ;;  %v670_v30 = vpop.permute.xlu0 %669  ;;  %v2898_v40 = vrot.slane %v2876_v23, %v5682_v2  ;;  %v5177_v25 = vld [vmem:[%s7417_s0 + $0x98] sm:$0xff]   ;;  %v1571_v23 = vcombine.high %v5947_v62, %v5947_v62 }
 0x113   :  { %v1376_v5 = vsel %vm1342_vm9, %v1319_v31, %v920_v47  ;;  %v979_v58 = vsel %vm943_vm2, %v5177_v25, %v5620_v39  ;;  %v5178_v39 = vld [vmem:[%s7417_s0 + $0x50] sm:$0xff]   ;;  %v5180_v31 = vld [vmem:[%s7417_s0 + $0x20] sm:$0xff]  }
 0x114   :  { %801 = vrot.lane.b32.xlu1 %v5424_v45, %s5211_s14  ;;  %v2905_v20 = vrot.slane %v2877_v55, %v5682_v2  ;;  %v2195_v61 = vcombine.high %v1376_v5, %v1376_v5  ;;  %v2202_v37 = vrot.slane %v1376_v5, %v5682_v2  ;;  %v953_v5 = vsel %vm943_vm2, %v5180_v31, %v5578_v10 }
 0x115   :  { %515 = vrot.lane.b32.xlu0 %v5819_v48, %s5207_s10  ;;  %v2914_v48 = vrot.slane %v2906_v35, %v5682_v2  ;;  %v6060_v10 = vrot.slane %v5178_v39, 1 }
 0x116   :  { %v728_v24 = vpop.permute.xlu1 %727  ;;  %v2907_v49 = vcombine.low %v2898_v40, %v2905_v20  ;;  %v574_v29 = vpop.permute.xlu0 %573  ;;  %v2209_v44 = vrot.slane %v2195_v61, %v5682_v2  ;;  %v2210_v34 = vcombine.high %v2202_v37, %v2202_v37  ;;  %v2218_v62 = vrot.slane %v2202_v37, %v5682_v2 }
 0x118   :  { %871 = vrot.lane.b32.xlu1 %v5468_v32, %s5212_s15  ;;  %v2921_v7 = vrot.slane %v2907_v49, %v5682_v2  ;;  %v2211_v55 = vcombine.high %v2209_v44, %v2209_v44  ;;  %v2232_v3 = vrot.slane %v2210_v34, %v5682_v2 }
 0x119   :  { %581 = vrot.lane.b32.xlu0 %v5909_v9, %s5209_s12 }
 0x11a   :  { %v794_v19 = vpop.permute.xlu1 %793  ;;  %v644_v60 = vpop.permute.xlu0 %643  ;;  %v2922_v22 = vcombine.low %v2914_v48, %v2921_v7  ;;  %v2239_v1 = vrot.slane %v2211_v55, %v5682_v2  ;;  %v3462_v14 = vcombine.low %v2218_v62, %v2232_v3 }
 0x11c   :  { %929 = vrot.lane.b32.xlu1 %v5991_v51, %s5214_s18  ;;  %5008 = vmatmul.mubr.msk.bf16.gmra.mrb[8].mxu0 %vm3991_vm10, %v2922_v22  ;;  %v1010_v22 = vsel %vm1000_vm3, %v953_v5, %v5956_v53  ;;  %v1618_v53 = vcombine.high %v5965_v46, %v5965_v46 }
 0x11d   :  { %651 = vrot.lane.b32.xlu0 %v5347_v57, %s5208_s11  ;;  %5011 = vmatprep.mubr.msk.bf16.mxu0 %vm5215_vm1, %v7430_v6  ;;  %v1036_v57 = vsel %vm1000_vm3, %v979_v58, %v5929_v26  ;;  %v1067_v37 = vsel %vm1057_vm4, %v1010_v22, %v574_v29  ;;  %v3472_v58 = vrot.slane %v3462_v14, %v5682_v2  ;;  %v5181_v22 = vld [vmem:[%s7417_s0 + $0xa0] sm:$0xff]  }
 0x11e   :  { %v864_v45 = vpop.permute.xlu1 %863  ;;  %v702_v9 = vpop.permute.xlu0 %701  ;;  %v1093_v36 = vsel %vm1057_vm4, %v1036_v57, %v5942_v0  ;;  %v1585_v0 = vrot.slane %v1571_v23, %v5682_v2  ;;  %v1124_v23 = vsel %vm1114_vm5, %v1067_v37, %v644_v60  ;;  %v981_v37 = vsel %vm943_vm2, %v5181_v22, %v5630_v43 }
 0x11f   :  { %v1150_v35 = vsel %vm1114_vm5, %v1093_v36, %v670_v30  ;;  %v2225_v30 = vrot.slane %v2209_v44, %v5682_v2  ;;  %v1181_v29 = vsel %vm1171_vm6, %v1124_v23, %v702_v9  ;;  %v6110_v23 = vld [vmem:[%s7417_s0 + $0xd0] sm:$0xff]  }
 0x120   :  { %517 = vrot.lane.b32.xlu1 %v480_v56, %s5207_s10  ;;  %v1207_v26 = vsel %vm1171_vm6, %v1150_v35, %v728_v24  ;;  %v4931_v24 = vcombine.high %v2218_v62, %v2232_v3  ;;  %v1587_v7 = vcombine.high %v1585_v0, %v1585_v0 }
 0x121   :  { %709 = vrot.lane.b32.xlu0 %v480_v56, %s5210_s13  ;;  %v1264_v56 = vsel %vm1228_vm7, %v1207_v26, %v794_v19  ;;  %v1601_v19 = vrot.slane %v1585_v0, %v5682_v2  ;;  %v3464_v25 = vcombine.low %v2225_v30, %v2239_v1 }
 0x122   :  { %v768_v47 = vpop.permute.xlu1 %767  ;;  %v6020_v4 = vpop.permute.xlu0 %535  ;;  %v1321_v40 = vsel %vm1285_vm8, %v1264_v56, %v864_v45  ;;  %v2241_v45 = vcombine.high %v2225_v30, %v2225_v30  ;;  %v3479_v57 = vrot.slane %v4931_v24, %v5682_v2  ;;  %v1615_v36 = vrot.slane %v1587_v7, %v5682_v2 }
 0x123   :  { %v1617_v55 = vcombine.high %v1601_v19, %v1601_v19  ;;  %v1238_v3 = vsel %vm1228_vm7, %v1181_v29, %v768_v47  ;;  %v3486_v0 = vrot.slane %v3464_v25, %v5682_v2  ;;  %v1038_v43 = vsel %vm1000_vm3, %v981_v37, %v6020_v4 }
 0x124   :  { %775 = vrot.lane.b32.xlu1 %v5178_v39, %s5211_s14  ;;  %v3494_v62 = vcombine.low %v3472_v58, %v3479_v57 }
 0x125   :  { %543 = vrot.lane.b32.xlu0 %v5923_v33, %s5207_s10  ;;  %v5179_v33 = vld [vmem:[%s7417_s0 + $0xc8] sm:$0xff]   ;;  %v2924_v47 = vcombine.low %v1615_v36, %v1617_v55 }
 0x126   :  { %v6034_v15 = vpop.permute.xlu1 %601  ;;  %v922_v20 = vpop.permute.xlu0 %921 }
 0x127   :  { %v1378_v49 = vsel %vm1342_vm9, %v1321_v40, %v922_v20  ;;  %v2940_v5 = vrot.slane %v2924_v47, %v5682_v2  ;;  %v1095_v29 = vsel %vm1057_vm4, %v1038_v43, %v6034_v15 }
 0x128   :  { %609 = vrot.lane.b32.xlu1 %v5179_v33, %s5209_s12  ;;  %v2250_v48 = vrot.slane %v1378_v49, %v5682_v2  ;;  %v2243_v20 = vcombine.high %v1378_v49, %v1378_v49  ;;  %v3502_v33 = vrot.slane %v3494_v62, %v5682_v2 }
 0x129   :  { %583 = vrot.lane.b32.xlu0 %v5178_v39, %s5209_s12 }
 0x12a   :  { %v6054_v61 = vpop.permute.xlu1 %509  ;;  %v6058_v44 = vrot.slane %v2250_v48, %v5682_v2  ;;  %v838_v34 = vpop.permute.xlu0 %837  ;;  %v2258_v14 = vcombine.high %v2250_v48, %v2250_v48 }
 0x12b   :  { %v1295_v60 = vsel %vm1285_vm8, %v1238_v3, %v838_v34 }
 0x12c   :  { %653 = vrot.lane.b32.xlu1 %v5371_v12, %s5208_s11  ;;  %v3465_v35 = vcombine.low %v2241_v45, %v6058_v44  ;;  %v2257_v45 = vrot.slane %v2243_v20, %v5682_v2  ;;  %v2280_v25 = vrot.slane %v2258_v14, %v5682_v2 }
 0x12d   :  { %845 = vrot.lane.b32.xlu0 %v5371_v12, %s5212_s15  ;;  %v2923_v12 = vcombine.low %v1618_v53, %v1601_v19  ;;  %v5183_v53 = vld [vmem:[%s7417_s0 + $0x58] sm:$0xff]  }
 0x12e   :  { %v896_v39 = vpop.permute.xlu1 %895  ;;  %v672_v26 = vpop.permute.xlu0 %671  ;;  %v3493_v46 = vrot.slane %v3465_v35, %v5682_v2  ;;  %v2273_v4 = vrot.slane %v2257_v45, %v5682_v2  ;;  %v2290_v62 = vcombine.high %v2280_v25, %v2280_v25  ;;  %v6131_v15 = vrot.slane %v5183_v53, 1 }
 0x12f   :  { %v6079_v9 = vsel %vm1342_vm9, %v1295_v60, %v896_v39  ;;  %v2259_v39 = vcombine.high %v2257_v45, %v2257_v45  ;;  %v1152_v60 = vsel %vm1114_vm5, %v1095_v29, %v672_v26  ;;  %v2288_v26 = vcombine.high %v6058_v44, %v6058_v44 }
 0x130   :  { %903 = vrot.lane.b32.xlu1 %v6060_v10, %s5214_s18  ;;  %v3495_v56 = vcombine.low %v3486_v0, %v3493_v46  ;;  %v1626_v30 = vrot.slane %v6079_v9, %v5682_v2  ;;  %v1619_v47 = vcombine.high %v6079_v9, %v6079_v9 }
 0x131   :  { %679 = vrot.lane.b32.xlu0 %v5468_v32, %s5208_s11  ;;  %v2933_v32 = vrot.slane %v2923_v12, %v5682_v2  ;;  %v3511_v22 = vcombine.low %v2280_v25, %v2288_v26 }
 0x132   :  { %v730_v40 = vpop.permute.xlu1 %729  ;;  %v6087_v1 = vpop.permute.xlu0 %575  ;;  %v1634_v24 = vcombine.high %v1626_v30, %v1626_v30  ;;  %v3509_v31 = vrot.slane %v3495_v56, %v5682_v2  ;;  %v1642_v49 = vrot.slane %v1626_v30, %v5682_v2 }
 0x133   :  { %v2955_v35 = vcombine.low %v2933_v32, %v2940_v5  ;;  %v1209_v12 = vsel %vm1171_vm6, %v1152_v60, %v730_v40  ;;  %v3512_v32 = vcombine.low %v2290_v62, %v2273_v4 }
 0x134   :  { %737 = vrot.lane.b32.xlu1 %v5991_v51, %s5210_s13  ;;  %v1656_v7 = vrot.slane %v1634_v24, %v5682_v2  ;;  %v3510_v19 = vcombine.low %v3502_v33, %v3509_v31  ;;  %v2287_v24 = vrot.slane %v2259_v39, %v5682_v2  ;;  %v2289_v33 = vcombine.high %v2273_v4, %v2273_v4 }
 0x135   :  { %711 = vrot.lane.b32.xlu0 %v6060_v10, %s5210_s13  ;;  %v2963_v40 = vrot.slane %v2955_v35, %v5682_v2 }
 0x136   :  { %v796_v48 = vpop.permute.xlu1 %795  ;;  %v646_v34 = vpop.permute.xlu0 %645  ;;  %v2925_v58 = vcombine.low %v1642_v49, %v1656_v7  ;;  %v4925_v57 = vcombine.high %v1642_v49, %v1656_v7  ;;  %5056 = vmatmul.mubr.msk.bf16.gmra.mrb[4].mxu1 %vm3991_vm10, %v3510_v19  ;;  %v5184_v49 = vld [vmem:[%s7417_s0 + $0x28] sm:$0xff]   ;;  %v6160_v19 = vrot.slane %v6110_v23, 1 }
 0x137   :  { %5059 = vmatprep.mubr.msk.bf16.mxu1 %vm5215_vm1, %v7430_v6  ;;  %v1266_v56 = vsel %vm1228_vm7, %v1209_v12, %v796_v48  ;;  %v955_v7 = vsel %vm943_vm2, %v5184_v49, %v5576_v54  ;;  %v1633_v48 = vrot.slane %v1619_v47, %v5682_v2  ;;  %v6216_v49 = vld [vmem:[%s7417_s0 + $0xd8] sm:$0xff]  }
 0x138   :  { %803 = vrot.lane.b32.xlu1 %v6110_v23, %s5211_s14  ;;  %v2947_v36 = vrot.slane %v2925_v58, %v5682_v2  ;;  %v2954_v55 = vrot.slane %v4925_v57, %v5682_v2  ;;  %v1012_v37 = vsel %vm1000_vm3, %v955_v7, %v6054_v61  ;;  %v3513_v57 = vcombine.low %v2287_v24, %v2289_v33 }
 0x139   :  { %777 = vrot.lane.b32.xlu0 %v5183_v53, %s5211_s14  ;;  %v1069_v54 = vsel %vm1057_vm4, %v1012_v37, %v6087_v1  ;;  %v3521_v1 = vrot.slane %v3511_v22, %v5682_v2 }
 0x13a   :  { %v866_v3 = vpop.permute.xlu1 %865  ;;  %v704_v0 = vpop.permute.xlu0 %703  ;;  %v2956_v46 = vcombine.low %v2947_v36, %v2954_v55  ;;  %v1126_v25 = vsel %vm1114_vm5, %v1069_v54, %v646_v34  ;;  %v1635_v36 = vcombine.high %v1633_v48, %v1633_v48  ;;  %v3535_v39 = vrot.slane %v3513_v57, %v5682_v2 }
 0x13b   :  { %v1323_v30 = vsel %vm1285_vm8, %v1266_v56, %v866_v3  ;;  %v1183_v55 = vsel %vm1171_vm6, %v1126_v25, %v704_v0 }
 0x13c   :  { %873 = vrot.lane.b32.xlu1 %v5479_v41, %s5212_s15  ;;  %v2970_v14 = vrot.slane %v2956_v46, %v5682_v2  ;;  %v1663_v12 = vrot.slane %v1635_v36, %v5682_v2  ;;  %v397_v36 = vshll.u32 %v6216_v49, 16 }
 0x13d   :  { %847 = vrot.lane.b32.xlu0 %v5365_v8, %s5212_s15 }
 0x13e   :  { %v924_v20 = vpop.permute.xlu1 %923  ;;  %v770_v31 = vpop.permute.xlu0 %769  ;;  %v2971_v44 = vcombine.low %v2963_v40, %v2970_v14 }
 0x13f   :  { %v6145_v9 = vsel %vm1342_vm9, %v1323_v30, %v924_v20  ;;  %v1240_v34 = vsel %vm1228_vm7, %v1183_v55, %v770_v31 }
 0x140   :  { %v2298_v5 = vrot.slane %v6145_v9, %v5682_v2  ;;  %905 = vrot.lane.b32.xlu1 %v6131_v15, %s5214_s18  ;;  %5012 = vmatmul.mubr.msk.bf16.gmra.mrb[12].mxu0 %vm3991_vm10, %v2971_v44 }
 0x141   :  { %519 = vrot.lane.b32.xlu0 %v6060_v10, %s5207_s10  ;;  %5015 = vmatprep.mubr.msk.bf16.mxu0 %vm5215_vm1, %v7430_v6  ;;  %v3528_v10 = vrot.slane %v3512_v32, %v5682_v2 }
 0x142   :  { %v2306_v45 = vcombine.high %v2298_v5, %v2298_v5  ;;  %v6165_v58 = vpop.permute.xlu1 %537  ;;  %v840_v43 = vpop.permute.xlu0 %839  ;;  %v6174_v29 = vrot.slane %v2298_v5, %v5682_v2 }
 0x143   :  { %v1297_v4 = vsel %vm1285_vm8, %v1240_v34, %v840_v43  ;;  %v3543_v46 = vcombine.low %v3521_v1, %v3528_v10 }
 0x144   :  { %v6177_v61 = vrot.slane %v2306_v45, %v5682_v2  ;;  %585 = vrot.lane.b32.xlu1 %v5183_v53, %s5209_s12  ;;  %v1649_v53 = vrot.slane %v1633_v48, %v5682_v2 }
 0x145   :  { %931 = vrot.lane.b32.xlu0 %v6160_v19, %s5214_s18  ;;  %v3551_v31 = vrot.slane %v3543_v46, %v5682_v2  ;;  %v395_v46 = vshrl.u32 %v6216_v49, 16 }
 0x146   :  { %v3514_v3 = vcombine.low %v6174_v29, %v6177_v61  ;;  %v604_v35 = vpop.permute.xlu1 %603  ;;  %v898_v60 = vpop.permute.xlu0 %897  ;;  %v1665_v33 = vcombine.high %v1649_v53, %v1649_v53  ;;  %v2972_v32 = vcombine.low %v1649_v53, %v1663_v12  ;;  %v399_v12 = vrot.slane %v397_v36, 1 }
 0x147   :  { %v1354_v62 = vsel %vm1342_vm9, %v1297_v4, %v898_v60  ;;  %v5186_v4 = vld [vmem:[%s7417_s0 + $0xa8] sm:$0xff]  }
 0x148   :  { %v3542_v0 = vrot.slane %v3514_v3, %v5682_v2  ;;  %655 = vrot.lane.b32.xlu1 %v5365_v8, %s5208_s11  ;;  %v1667_v47 = vcombine.high %v1354_v62, %v1354_v62  ;;  %v1674_v56 = vrot.slane %v1354_v62, %v5682_v2  ;;  %v2291_v8 = vcombine.high %v6145_v9, %v6145_v9 }
 0x149   :  { %545 = vrot.lane.b32.xlu0 %v5991_v51, %s5207_s10  ;;  %v2982_v10 = vrot.slane %v2972_v32, %v5682_v2  ;;  %v983_v60 = vsel %vm943_vm2, %v5186_v4, %v5628_v28 }
 0x14a   :  { %v3544_v26 = vcombine.low %v3535_v39, %v3542_v0  ;;  %v674_v30 = vpop.permute.xlu1 %673  ;;  %v6199_v20 = vrot.slane %v1667_v47, %v5682_v2  ;;  %v1682_v40 = vcombine.high %v1674_v56, %v1674_v56  ;;  %v1690_v14 = vrot.slane %v1674_v56, %v5682_v2  ;;  %v6202_v24 = vpop.permute.xlu0 %511 }
 0x14b   :  { %v2305_v54 = vrot.slane %v2291_v8, %v5682_v2  ;;  %v1040_v0 = vsel %vm1000_vm3, %v983_v60, %v6165_v58 }
 0x14c   :  { %713 = vrot.lane.b32.xlu1 %v6131_v15, %s5210_s13  ;;  %v3558_v51 = vrot.slane %v3544_v26, %v5682_v2  ;;  %v1704_v5 = vrot.slane %v1682_v40, %v5682_v2  ;;  %v1712_v44 = vcombine.high %v1690_v14, %v1690_v14  ;;  %v2973_v9 = vcombine.low %v1665_v33, %v1690_v14 }
 0x14d   :  { %611 = vrot.lane.b32.xlu0 %v6110_v23, %s5209_s12  ;;  %v6220_v22 = vrot.slane %v6199_v20, %v5682_v2  ;;  %v5185_v23 = vld [vmem:[%s7417_s0 + $0x60] sm:$0xff]   ;;  %v1097_v47 = vsel %vm1057_vm4, %v1040_v0, %v604_v35 }
 0x14e   :  { %v732_v7 = vpop.permute.xlu1 %731  ;;  %v3559_v48 = vcombine.low %v3551_v31, %v3558_v51  ;;  %v1714_v37 = vcombine.high %v1704_v5, %v1704_v5  ;;  %v2974_v45 = vcombine.low %v1704_v5, %v1712_v44  ;;  %v578_v57 = vpop.permute.xlu0 %577  ;;  %v2989_v43 = vrot.slane %v2973_v9, %v5682_v2 }
 0x14f   :  { %v6245_v53 = vrot.slane %v5185_v23, 1  ;;  %v1154_v28 = vsel %vm1114_vm5, %v1097_v47, %v674_v30  ;;  %v6263_v31 = vor.u32 %v399_v12, %v395_v46  ;;  %v2321_v30 = vrot.slane %v2305_v54, %v5682_v2 }
 0x150   :  { %779 = vrot.lane.b32.xlu1 %v5185_v23, %s5211_s14  ;;  %5060 = vmatmul.mubr.msk.bf16.gmra.mrb[8].mxu1 %vm3991_vm10, %v3559_v48  ;;  %v2975_v25 = vcombine.low %v1714_v37, %v6220_v22  ;;  %v2996_v1 = vrot.slane %v2974_v45, %v5682_v2  ;;  %v3004_v34 = vcombine.low %v2982_v10, %v2989_v43  ;;  %v5187_v48 = vld [vmem:[%s7417_s0 + $0x30] sm:$0xff]   ;;  %v6285_v45 = vrot.slane %v6216_v49, 1 }
 0x151   :  { %681 = vrot.lane.b32.xlu0 %v5479_v41, %s5208_s11  ;;  %5063 = vmatprep.mubr.msk.bf16.mxu1 %vm5215_vm1, %v7430_v6  ;;  %v2307_v41 = vcombine.high %v2305_v54, %v2305_v54  ;;  %v1211_v58 = vsel %vm1171_vm6, %v1154_v28, %v732_v7  ;;  %v957_v37 = vsel %vm943_vm2, %v5187_v48, %v5585_v16 }
 0x152   :  { %v798_v55 = vpop.permute.xlu1 %797  ;;  %v3003_v3 = vrot.slane %v2975_v25, %v5682_v2  ;;  %v648_v39 = vpop.permute.xlu0 %647  ;;  %v3012_v40 = vrot.slane %v3004_v34, %v5682_v2  ;;  %v4932_v54 = vcombine.high %v6174_v29, %v6177_v61  ;;  %v2337_v16 = vcombine.high %v2321_v30, %v2321_v30 }
 0x153   :  { %v2335_v8 = vrot.slane %v2307_v41, %v5682_v2  ;;  %v1268_v33 = vsel %vm1228_vm7, %v1211_v58, %v798_v55  ;;  %v1683_v61 = vcombine.high %v6199_v20, %v6199_v20 }
 0x154   :  { %849 = vrot.lane.b32.xlu1 %v5397_v27, %s5212_s15  ;;  %v3005_v62 = vcombine.low %v2996_v1, %v3003_v3 }
 0x155   :  { %739 = vrot.lane.b32.xlu0 %v6160_v19, %s5210_s13  ;;  %v3561_v9 = vcombine.low %v2321_v30, %v2335_v8  ;;  %v1711_v47 = vrot.slane %v1683_v61, %v5682_v2 }
 0x156   :  { %v868_v56 = vpop.permute.xlu1 %867  ;;  %v706_v26 = vpop.permute.xlu0 %705  ;;  %v3019_v14 = vrot.slane %v3005_v62, %v5682_v2 }
 0x157   :  { %v1325_v51 = vsel %vm1285_vm8, %v1268_v33, %v868_v56  ;;  %v3577_v1 = vrot.slane %v3561_v9, %v5682_v2  ;;  %v1713_v56 = vcombine.high %v6220_v22, %v6220_v22 }
 0x158   :  { %907 = vrot.lane.b32.xlu1 %v6245_v53, %s5214_s18  ;;  %v3020_v35 = vcombine.low %v3012_v40, %v3019_v14 }
 0x159   :  { %805 = vrot.lane.b32.xlu0 %v6216_v49, %s5211_s14 }
 0x15a   :  { %v926_v32 = vpop.permute.xlu1 %925  ;;  %5016 = vmatmul.mubr.msk.bf16.gmra.mrb[16].mxu0 %vm3991_vm10, %v3020_v35  ;;  %v772_v44 = vpop.permute.xlu0 %771  ;;  %v3021_v35 = vcombine.low %v1711_v47, %v1713_v56 }
 0x15b   :  { %v6268_v5 = vsel %vm1342_vm9, %v1325_v51, %v926_v32  ;;  %5019 = vmatprep.mubr.msk.bf16.mxu0 %vm5215_vm1, %v7430_v6 }
 0x15c   :  { %v2346_v7 = vrot.slane %v6268_v5, %v5682_v2  ;;  %521 = vrot.lane.b32.xlu1 %v6131_v15, %s5207_s10  ;;  %v1014_v15 = vsel %vm1000_vm3, %v957_v37, %v6202_v24  ;;  %v2339_v32 = vcombine.high %v6268_v5, %v6268_v5  ;;  %v3031_v5 = vrot.slane %v3021_v35, %v5682_v2 }
 0x15d   :  { %875 = vrot.lane.b32.xlu0 %v6263_v31, %s5212_s15  ;;  %v1071_v36 = vsel %vm1057_vm4, %v1014_v15, %v578_v57  ;;  %v3570_v57 = vrot.slane %v4932_v54, %v5682_v2 }
 0x15e   :  { %v2354_v43 = vcombine.high %v2346_v7, %v2346_v7  ;;  %v2362_v10 = vrot.slane %v2346_v7, %v5682_v2  ;;  %v6292_v25 = vpop.permute.xlu1 %539  ;;  %v842_v55 = vpop.permute.xlu0 %841  ;;  %v1128_v3 = vsel %vm1114_vm5, %v1071_v36, %v648_v39 }
 0x15f   :  { %v1185_v24 = vsel %vm1171_vm6, %v1128_v3, %v706_v26  ;;  %v3592_v62 = vcombine.low %v3570_v57, %v3577_v1 }
 0x160   :  { %v6298_v34 = vrot.slane %v2354_v43, %v5682_v2  ;;  %v2384_v29 = vcombine.high %v2362_v10, %v2362_v10  ;;  %587 = vrot.lane.b32.xlu1 %v5185_v23, %s5209_s12  ;;  %v3562_v4 = vcombine.low %v2337_v16, %v2362_v10  ;;  %v1242_v39 = vsel %vm1228_vm7, %v1185_v24, %v772_v44  ;;  %v6345_v43 = vld [vmem:[%s7417_s0 + $0x68] sm:$0xff]  }
 0x161   :  { %933 = vrot.lane.b32.xlu0 %v6285_v45, %s5214_s18  ;;  %v1299_v0 = vsel %vm1285_vm8, %v1242_v39, %v842_v55  ;;  %v2353_v55 = vrot.slane %v2339_v32, %v5682_v2  ;;  %v5190_v32 = vld [vmem:[%s7417_s0 + $0x38] sm:$0xff]  }
 0x162   :  { %v3563_v60 = vcombine.low %v6298_v34, %v2384_v29  ;;  %v6309_v41 = vpop.permute.xlu1 %605  ;;  %v900_v23 = vpop.permute.xlu0 %899  ;;  %v3584_v20 = vrot.slane %v3562_v4, %v5682_v2 }
 0x163   :  { %v1356_v12 = vsel %vm1342_vm9, %v1299_v0, %v900_v23  ;;  %v2369_v39 = vrot.slane %v2353_v55, %v5682_v2 }
 0x164   :  { %v3591_v46 = vrot.slane %v3563_v60, %v5682_v2  ;;  %657 = vrot.lane.b32.xlu1 %v5397_v27, %s5208_s11  ;;  %v1715_v28 = vcombine.high %v1356_v12, %v1356_v12  ;;  %v1722_v26 = vrot.slane %v1356_v12, %v5682_v2  ;;  %v3600_v27 = vrot.slane %v3592_v62, %v5682_v2 }
 0x165   :  { %547 = vrot.lane.b32.xlu0 %v6160_v19, %s5207_s10  ;;  %v2355_v60 = vcombine.high %v2353_v55, %v2353_v55 }
 0x166   :  { %v3593_v40 = vcombine.low %v3584_v20, %v3591_v46  ;;  %v676_v14 = vpop.permute.xlu1 %675  ;;  %v1729_v8 = vrot.slane %v1715_v28, %v5682_v2  ;;  %v1730_v58 = vcombine.high %v1722_v26, %v1722_v26  ;;  %v1738_v51 = vrot.slane %v1722_v26, %v5682_v2 }
 0x167   :  { %v6324_v33 = vpop.permute.xlu0 %513  ;;  %v6376_v20 = vrot.slane %v6345_v43, 1  ;;  %v2383_v26 = vrot.slane %v2355_v60, %v5682_v2 }
 0x168   :  { %715 = vrot.lane.b32.xlu1 %v6245_v53, %s5210_s13  ;;  %v3607_v22 = vrot.slane %v3593_v40, %v5682_v2  ;;  %v1731_v30 = vcombine.high %v1729_v8, %v1729_v8  ;;  %v1752_v19 = vrot.slane %v1730_v58, %v5682_v2  ;;  %v6337_v7 = vrot.slane %v1729_v8, %v5682_v2 }
 0x169   :  { %613 = vrot.lane.b32.xlu0 %v6216_v49, %s5209_s12  ;;  %v6353_v49 = vld [vmem:[%s7417_s0 + $0xe0] sm:$0xff]   ;;  %v2385_v40 = vcombine.high %v2369_v39, %v2369_v39  ;;  %v2386_v8 = vcombine.high %v6298_v34, %v6298_v34 }
 0x16a   :  { %v734_v44 = vpop.permute.xlu1 %733  ;;  %v3608_v9 = vcombine.low %v3600_v27, %v3607_v22  ;;  %v1759_v48 = vrot.slane %v1731_v30, %v5682_v2  ;;  %v3022_v37 = vcombine.low %v1738_v51, %v1752_v19  ;;  %v4926_v54 = vcombine.high %v1738_v51, %v1752_v19 }
 0x16b   :  { %v6340_v15 = vpop.permute.xlu0 %579  ;;  %v404_v24 = vshll.u32 %v6353_v49, 16  ;;  %v402_v46 = vshrl.u32 %v6353_v49, 16  ;;  %v3609_v35 = vcombine.low %v2386_v8, %v2369_v39  ;;  %v3610_v30 = vcombine.low %v2383_v26, %v2385_v40 }
 0x16c   :  { %781 = vrot.lane.b32.xlu1 %v6345_v43, %s5211_s14  ;;  %5064 = vmatmul.mubr.msk.bf16.gmra.mrb[12].mxu1 %vm3991_vm10, %v3608_v9  ;;  %v3024_v10 = vcombine.low %v6337_v7, %v1759_v48  ;;  %v3038_v36 = vrot.slane %v3022_v37, %v5682_v2  ;;  %v3045_v1 = vrot.slane %v4926_v54, %v5682_v2  ;;  %v6422_v54 = vld [vmem:[%s7417_s0 + $0xe8] sm:$0xff]  }
 0x16d   :  { %683 = vrot.lane.b32.xlu0 %v6263_v31, %s5208_s11  ;;  %5067 = vmatprep.mubr.msk.bf16.mxu1 %vm5215_vm1, %v7430_v6  ;;  %v406_v12 = vrot.slane %v404_v24, 1  ;;  %v1761_v26 = vcombine.high %v6337_v7, %v6337_v7 }
 0x16e   :  { %v800_v16 = vpop.permute.xlu1 %799  ;;  %v3052_v3 = vrot.slane %v3024_v10, %v5682_v2  ;;  %v3053_v29 = vcombine.low %v3031_v5, %v3038_v36  ;;  %v3619_v5 = vrot.slane %v3609_v35, %v5682_v2  ;;  %v3626_v10 = vrot.slane %v3610_v30, %v5682_v2 }
 0x16f   :  { %v650_v61 = vpop.permute.xlu0 %649  ;;  %v6397_v22 = vor.u32 %v406_v12, %v402_v46  ;;  %v5191_v12 = vld [vmem:[%s7417_s0 + $0xb8] sm:$0xff]  }
 0x170   :  { %741 = vrot.lane.b32.xlu1 %v6285_v45, %s5210_s13  ;;  %v3054_v4 = vcombine.low %v3045_v1, %v3052_v3  ;;  %v3061_v23 = vrot.slane %v3053_v29, %v5682_v2  ;;  %v6437_v29 = vrot.slane %v6353_v49, 1 }
 0x171   :  { %465 = vrot.lane.b32.xlu0 %v6263_v31, %s5206_s26  ;;  %v5189_v31 = vld [vmem:[%s7417_s0 + $0xb0] sm:$0xff]  }
 0x172   :  { %v870_v57 = vpop.permute.xlu1 %869  ;;  %v3068_v62 = vrot.slane %v3054_v4, %v5682_v2  ;;  %v985_v47 = vsel %vm943_vm2, %v5189_v31, %v5637_v50  ;;  %v987_v31 = vsel %vm943_vm2, %v5191_v12, %v5635_v13 }
 0x173   :  { %v708_v0 = vpop.permute.xlu0 %707 }
 0x174   :  { %549 = vrot.lane.b32.xlu1 %v6285_v45, %s5207_s10  ;;  %v3069_v56 = vcombine.low %v3061_v23, %v3068_v62  ;;  %v1042_v45 = vsel %vm1000_vm3, %v985_v47, %v6292_v25 }
 0x175   :  { %851 = vrot.lane.b32.xlu0 %v5383_v21, %s5212_s15  ;;  %v1099_v58 = vsel %vm1057_vm4, %v1042_v45, %v6309_v41 }
 0x176   :  { %v774_v28 = vpop.permute.xlu1 %773  ;;  %5020 = vmatmul.mubr.msk.bf16.gmra.mrb[20].mxu0 %vm3991_vm10, %v3069_v56  ;;  %v1156_v27 = vsel %vm1114_vm5, %v1099_v58, %v676_v14 }
 0x177   :  { %v542_v50 = vpop.permute.xlu0 %541  ;;  %5023 = vmatprep.mubr.msk.bf16.mxu0 %vm5215_vm1, %v7430_v6  ;;  %v1213_v25 = vsel %vm1171_vm6, %v1156_v27, %v734_v44  ;;  %v959_v44 = vsel %vm943_vm2, %v5190_v32, %v5583_v11 }
 0x178   :  { %909 = vrot.lane.b32.xlu1 %v6376_v20, %s5214_s18  ;;  %v1270_v34 = vsel %vm1228_vm7, %v1213_v25, %v800_v16  ;;  %v1016_v48 = vsel %vm1000_vm3, %v959_v44, %v6324_v33  ;;  %v1044_v27 = vsel %vm1000_vm3, %v987_v31, %v542_v50 }
 0x179   :  { %807 = vrot.lane.b32.xlu0 %v6353_v49, %s5211_s14  ;;  %v1327_v14 = vsel %vm1285_vm8, %v1270_v34, %v870_v57  ;;  %v1073_v11 = vsel %vm1057_vm4, %v1016_v48, %v6340_v15 }
 0x17a   :  { %v608_v41 = vpop.permute.xlu1 %607  ;;  %v1130_v55 = vsel %vm1114_vm5, %v1073_v11, %v650_v61  ;;  %v411_v61 = vshll.u32 %v6422_v54, 16 }
 0x17b   :  { %v928_v51 = vpop.permute.xlu0 %927  ;;  %v1187_v33 = vsel %vm1171_vm6, %v1130_v55, %v708_v0  ;;  %v3641_v0 = vcombine.low %v3619_v5, %v3626_v10  ;;  %v1101_v35 = vsel %vm1057_vm4, %v1044_v27, %v608_v41 }
 0x17c   :  { %v1384_v19 = vsel %vm1342_vm9, %v1327_v14, %v928_v51  ;;  %877 = vrot.lane.b32.xlu1 %v6397_v22, %s5212_s15  ;;  %v1244_v15 = vsel %vm1228_vm7, %v1187_v33, %v774_v28  ;;  %v413_v45 = vrot.slane %v411_v61, 1 }
 0x17d   :  { %v2394_v9 = vrot.slane %v1384_v19, %v5682_v2  ;;  %615 = vrot.lane.b32.xlu0 %v6353_v49, %s5209_s12  ;;  %v2387_v23 = vcombine.high %v1384_v19, %v1384_v19  ;;  %v3649_v58 = vrot.slane %v3641_v0, %v5682_v2 }
 0x17e   :  { %v678_v37 = vpop.permute.xlu1 %677 }
 0x17f   :  { %v2402_v36 = vcombine.high %v2394_v9, %v2394_v9  ;;  %v844_v16 = vpop.permute.xlu0 %843  ;;  %v2410_v1 = vrot.slane %v2394_v9, %v5682_v2  ;;  %v2401_v13 = vrot.slane %v2387_v23, %v5682_v2  ;;  %v1158_v50 = vsel %vm1114_vm5, %v1101_v35, %v678_v37 }
 0x180   :  { %685 = vrot.lane.b32.xlu1 %v6397_v22, %s5208_s11  ;;  %v1301_v60 = vsel %vm1285_vm8, %v1244_v15, %v844_v16 }
 0x181   :  { %v2424_v3 = vrot.slane %v2402_v36, %v5682_v2  ;;  %523 = vrot.lane.b32.xlu0 %v6245_v53, %s5207_s10  ;;  %v2403_v10 = vcombine.high %v2401_v13, %v2401_v13 }
 0x182   :  { %v736_v24 = vpop.permute.xlu1 %735 }
 0x183   :  { %v3611_v4 = vcombine.low %v2410_v1, %v2424_v3  ;;  %v4933_v57 = vcombine.high %v2410_v1, %v2424_v3  ;;  %v902_v39 = vpop.permute.xlu0 %901  ;;  %v1215_v11 = vsel %vm1171_vm6, %v1158_v50, %v736_v24  ;;  %v2417_v24 = vrot.slane %v2401_v13, %v5682_v2 }
 0x184   :  { %v1358_v62 = vsel %vm1342_vm9, %v1301_v60, %v902_v39  ;;  %589 = vrot.lane.b32.xlu1 %v6345_v43, %s5209_s12  ;;  %v409_v43 = vshrl.u32 %v6422_v54, 16  ;;  %v6497_v60 = vld [vmem:[%s7417_s0 + $0x70] sm:$0xff]   ;;  %v2431_v39 = vrot.slane %v2403_v10, %v5682_v2 }
 0x185   :  { %v3633_v53 = vrot.slane %v3611_v4, %v5682_v2  ;;  %v3640_v49 = vrot.slane %v4933_v57, %v5682_v2  ;;  %v1763_v46 = vcombine.high %v1358_v62, %v1358_v62  ;;  %935 = vrot.lane.b32.xlu0 %v6437_v29, %s5214_s18  ;;  %v1770_v47 = vrot.slane %v1358_v62, %v5682_v2 }
 0x186   :  { %v802_v56 = vpop.permute.xlu1 %801  ;;  %v6474_v44 = vor.u32 %v413_v45, %v409_v43  ;;  %v2433_v43 = vcombine.high %v2417_v24, %v2417_v24  ;;  %v622_v27 = vshrl.u32 %v6497_v60, 16 }
 0x187   :  { %v3642_v28 = vcombine.low %v3633_v53, %v3640_v49  ;;  %v1777_v40 = vrot.slane %v1763_v46, %v5682_v2  ;;  %v6459_v8 = vpop.permute.xlu0 %515  ;;  %v1778_v25 = vcombine.high %v1770_v47, %v1770_v47  ;;  %v1786_v34 = vrot.slane %v1770_v47, %v5682_v2 }
 0x188   :  { %659 = vrot.lane.b32.xlu1 %v5383_v21, %s5208_s11  ;;  %v1272_v55 = vsel %vm1228_vm7, %v1215_v11, %v802_v56  ;;  %v624_v49 = vshll.u32 %v6497_v60, 16 }
 0x189   :  { %v1779_v30 = vcombine.high %v1777_v40, %v1777_v40  ;;  %v1793_v7 = vrot.slane %v1777_v40, %v5682_v2  ;;  %743 = vrot.lane.b32.xlu0 %v6437_v29, %s5210_s13  ;;  %v3656_v14 = vrot.slane %v3642_v28, %v5682_v2  ;;  %v1800_v51 = vrot.slane %v1778_v25, %v5682_v2 }
 0x18a   :  { %v1808_v19 = vcombine.high %v1786_v34, %v1786_v34  ;;  %v872_v32 = vpop.permute.xlu1 %871  ;;  %v3070_v41 = vcombine.low %v1761_v26, %v1786_v34  ;;  %v6514_v28 = vrot.slane %v6422_v54, 1  ;;  %v3658_v26 = vcombine.low %v2417_v24, %v2431_v39 }
 0x18b   :  { %v1807_v21 = vrot.slane %v1779_v30, %v5682_v2  ;;  %v1809_v9 = vcombine.high %v1793_v7, %v1793_v7  ;;  %v6477_v48 = vpop.permute.xlu0 %581  ;;  %v3657_v5 = vcombine.low %v3649_v58, %v3656_v14  ;;  %v1810_v36 = vcombine.high %v1800_v51, %v1800_v51 }
 0x18c   :  { %v3071_v16 = vcombine.low %v1800_v51, %v1808_v19  ;;  %467 = vrot.lane.b32.xlu1 %v6397_v22, %s5206_s26  ;;  %v1329_v3 = vsel %vm1285_vm8, %v1272_v55, %v872_v32  ;;  %v3080_v22 = vrot.slane %v3070_v41, %v5682_v2  ;;  %v626_v35 = vrot.slane %v624_v49, 1  ;;  %v5192_v55 = vld [vmem:[%s7417_s0 + $0x40] sm:$0xff]   ;;  %v6584_v49 = vld [vmem:[%s7417_s0 + $0x78] sm:$0xff]  }
 0x18d   :  { %v3073_v37 = vcombine.low %v1807_v21, %v1809_v9  ;;  %809 = vrot.lane.b32.xlu0 %v6422_v54, %s5211_s14  ;;  %5068 = vmatmul.mubr.msk.bf16.gmra.mrb[16].mxu1 %vm3991_vm10, %v3657_v5  ;;  %v3072_v33 = vcombine.low %v1810_v36, %v1793_v7  ;;  %v3668_v21 = vrot.slane %v3658_v26, %v5682_v2  ;;  %v4451_v26 = vld [vmem:[%s7419_s2 + $0x8] sm:$0xff] }
 0x18e   :  { %v3087_v1 = vrot.slane %v3071_v16, %v5682_v2  ;;  %v930_v15 = vpop.permute.xlu1 %929  ;;  %5071 = vmatprep.mubr.msk.bf16.mxu1 %vm5215_vm1, %v7430_v6  ;;  %v627_v9 = vor.u32 %v626_v35, %v622_v27  ;;  %v5193_v27 = vld [vmem:[%s7417_s0 + $0x48] sm:$0xff]  }
 0x18f   :  { %v3101_v61 = vrot.slane %v3073_v37, %v5682_v2  ;;  %v1386_v4 = vsel %vm1342_vm9, %v1329_v3, %v930_v15  ;;  %v652_v57 = vpop.permute.xlu0 %651  ;;  %v3094_v0 = vrot.slane %v3072_v33, %v5682_v2  ;;  %v6550_v37 = vld [vmem:[%s7417_s0 + $0xf0] sm:$0xff]   ;;  %v961_v33 = vsel %vm943_vm2, %v5192_v55, %v5592_v18 }
 0x190   :  { %v2435_v23 = vcombine.high %v1386_v4, %v1386_v4  ;;  %v2442_v62 = vrot.slane %v1386_v4, %v5682_v2  ;;  %879 = vrot.lane.b32.xlu1 %v6474_v44, %s5212_s15  ;;  %v3102_v53 = vcombine.low %v3080_v22, %v3087_v1  ;;  %v631_v18 = vshll.u32 %v6550_v37, 16 }
 0x191   :  { %717 = vrot.lane.b32.xlu0 %v6376_v20, %s5210_s13  ;;  %v3103_v56 = vcombine.low %v3094_v0, %v3101_v61 }
 0x192   :  { %v6508_v46 = vrot.slane %v2435_v23, %v5682_v2  ;;  %v2450_v12 = vcombine.high %v2442_v62, %v2442_v62  ;;  %v2458_v31 = vrot.slane %v2442_v62, %v5682_v2  ;;  %v6511_v47 = vpop.permute.xlu1 %517  ;;  %v3110_v25 = vrot.slane %v3102_v53, %v5682_v2 }
 0x193   :  { %v710_v45 = vpop.permute.xlu0 %709  ;;  %v3117_v34 = vrot.slane %v3103_v56, %v5682_v2  ;;  %v629_v62 = vshrl.u32 %v6550_v37, 16  ;;  %v633_v53 = vrot.slane %v631_v18, 1 }
 0x194   :  { %v2472_v40 = vrot.slane %v2450_v12, %v5682_v2  ;;  %v2480_v58 = vcombine.high %v2458_v31, %v2458_v31  ;;  %783 = vrot.lane.b32.xlu1 %v6497_v60, %s5211_s14  ;;  %v3659_v13 = vcombine.low %v2433_v43, %v2458_v31  ;;  %v6526_v30 = vrot.slane %v6508_v46, %v5682_v2  ;;  %v4450_v31 = vld [vmem:[%s7419_s2] sm:$0xff] }
 0x195   :  { %551 = vrot.lane.b32.xlu0 %v6437_v29, %s5207_s10  ;;  %v3118_v19 = vcombine.low %v3110_v25, %v3117_v34 }
 0x196   :  { %v2482_v7 = vcombine.high %v2472_v40, %v2472_v40  ;;  %v3660_v14 = vcombine.low %v2472_v40, %v2480_v58  ;;  %v776_v50 = vpop.permute.xlu1 %775  ;;  %v3675_v51 = vrot.slane %v3659_v13, %v5682_v2  ;;  %v6599_v40 = vor.u32 %v633_v53, %v629_v62 }
 0x197   :  { %v6529_v32 = vpop.permute.xlu0 %543  ;;  %5024 = vmatmul.mubr.msk.bf16.gmra.mrb[24].mxu0 %vm3991_vm10, %v3118_v19  ;;  %v6603_v58 = vcombine.high %v4450_v31, %v4450_v31  ;;  %v963_v13 = vsel %vm943_vm2, %v5193_v27, %v5590_v17  ;;  %v692_v19 = vrot.slane %v6550_v37, 1  ;;  %v816_v17 = vshrl.u32 %v6584_v49, 16 }
 0x198   :  { %v3661_v29 = vcombine.low %v2482_v7, %v6526_v30  ;;  %617 = vrot.lane.b32.xlu1 %v6422_v54, %s5209_s12  ;;  %v3682_v41 = vrot.slane %v3660_v14, %v5682_v2  ;;  %v3690_v10 = vcombine.low %v3668_v21, %v3675_v51  ;;  %5027 = vmatprep.mubr.msk.bf16.mxu0 %vm5215_vm1, %v7430_v6  ;;  %v691_v54 = vrot.slane %v6497_v60, 1 }
 0x199   :  { %937 = vrot.lane.b32.xlu0 %v6514_v28, %s5214_s18  ;;  %v6611_v51 = vcombine.high %v4451_v26, %v4451_v26  ;;  %v1020_v21 = vsel %vm1000_vm3, %v963_v13, %v6511_v47  ;;  %v885_v53 = vrot.slane %v6584_v49, 1 }
 0x19a   :  { %v3689_v5 = vrot.slane %v3661_v29, %v5682_v2  ;;  %v6540_v11 = vpop.permute.xlu1 %609  ;;  %v3698_v3 = vrot.slane %v3690_v10, %v5682_v2 }
 0x19b   :  { %v584_v36 = vpop.permute.xlu0 %583 }
 0x19c   :  { %525 = vrot.lane.b32.xlu1 %v6376_v20, %s5207_s10  ;;  %v3691_v16 = vcombine.low %v3682_v41, %v3689_v5  ;;  %v1018_v20 = vsel %vm1000_vm3, %v961_v33, %v6459_v8  ;;  %v1077_v5 = vsel %vm1057_vm4, %v1020_v21, %v584_v36 }
 0x19d   :  { %853 = vrot.lane.b32.xlu0 %v627_v9, %s5212_s15  ;;  %v1075_v24 = vsel %vm1057_vm4, %v1018_v20, %v6477_v48 }
 0x19e   :  { %v654_v1 = vpop.permute.xlu1 %653  ;;  %v3705_v15 = vrot.slane %v3691_v16, %v5682_v2  ;;  %v1132_v61 = vsel %vm1114_vm5, %v1075_v24, %v652_v57 }
 0x19f   :  { %v846_v22 = vpop.permute.xlu0 %845  ;;  %v1189_v39 = vsel %vm1171_vm6, %v1132_v61, %v710_v45  ;;  %v1134_v20 = vsel %vm1114_vm5, %v1077_v5, %v654_v1 }
 0x1a0   :  { %911 = vrot.lane.b32.xlu1 %v691_v54, %s5214_s18  ;;  %v3706_v4 = vcombine.low %v3698_v3, %v3705_v15  ;;  %v1246_v8 = vsel %vm1228_vm7, %v1189_v39, %v776_v50  ;;  %v5194_v39 = vld [vmem:[%s7417_s0 + $0xc0] sm:$0xff]  }
 0x1a1   :  { %687 = vrot.lane.b32.xlu0 %v6474_v44, %s5208_s11  ;;  %v1303_v48 = vsel %vm1285_vm8, %v1246_v8, %v846_v22  ;;  %v7431_v8 = vld [vmem:[#allocation7_spill] sm:$0xff] }
 0x1a2   :  { %v904_v0 = vpop.permute.xlu1 %903  ;;  %5072 = vmatmul.mubr.msk.bf16.gmra.mrb[20].mxu1 %vm3991_vm10, %v3706_v4 }
 0x1a3   :  { %v6573_v23 = vpop.permute.xlu0 %679  ;;  %5075 = vmatprep.mubr.msk.bf16.mxu1 %vm5215_vm1, %v7430_v6  ;;  %v1360_v57 = vsel %vm1342_vm9, %v1303_v48, %v904_v0  ;;  %v989_v0 = vsel %vm943_vm2, %v5194_v39, %v7431_v8 }
 0x1a4   :  { %745 = vrot.lane.b32.xlu1 %v6514_v28, %s5210_s13  ;;  %v1811_v56 = vcombine.high %v1360_v57, %v1360_v57  ;;  %v1818_v45 = vrot.slane %v1360_v57, %v5682_v2 }
 0x1a5   :  { %591 = vrot.lane.b32.xlu0 %v6497_v60, %s5209_s12  ;;  %v818_v60 = vshll.u32 %v6584_v49, 16 }
 0x1a6   :  { %v6588_v12 = vpop.permute.xlu1 %737  ;;  %v1825_v35 = vrot.slane %v1811_v56, %v5682_v2  ;;  %v1826_v29 = vcombine.high %v1818_v45, %v1818_v45  ;;  %v1834_v48 = vrot.slane %v1818_v45, %v5682_v2  ;;  %v1046_v56 = vsel %vm1000_vm3, %v989_v0, %v6529_v32 }
 0x1a7   :  { %v712_v43 = vpop.permute.xlu0 %711  ;;  %v820_v41 = vrot.slane %v818_v60, 1 }
 0x1a8   :  { %811 = vrot.lane.b32.xlu1 %v6550_v37, %s5211_s14  ;;  %v1827_v3 = vcombine.high %v1825_v35, %v1825_v35  ;;  %v1848_v4 = vrot.slane %v1826_v29, %v5682_v2  ;;  %v1191_v36 = vsel %vm1171_vm6, %v1134_v20, %v712_v43  ;;  %v1841_v43 = vrot.slane %v1825_v35, %v5682_v2 }
 0x1a9   :  { %661 = vrot.lane.b32.xlu0 %v627_v9, %s5208_s11  ;;  %v4105_v25 = vpop.f32.mrb[0].mxu0  ;;  %v821_v18 = vor.u32 %v820_v41, %v816_v17  ;;  %v2451_v35 = vcombine.high %v6508_v46, %v6508_v46 }
 0x1aa   :  { %v804_v34 = vpop.permute.xlu1 %803  ;;  %v4352_v7 = vcombine.high %v4105_v25, %v4105_v25  ;;  %v5001_v14 = vpop.f32.mrb[1].mxu0  ;;  %v4547_v10 = vadd.f32 %v4450_v31, %v4105_v25  ;;  %v6646_v31 = vld [vmem:[%s7417_s0 + $0xf8] sm:$0xff]   ;;  %v3119_v27 = vcombine.low %v1834_v48, %v1848_v4  ;;  %v4927_v13 = vcombine.high %v1834_v48, %v1848_v4 }
 0x1ab   :  { %v778_v50 = vpop.permute.xlu0 %777  ;;  %v4108_v9 = vpop.f32.mrb[2].mxu0  ;;  %v1857_v29 = vcombine.high %v1841_v43, %v1841_v43  ;;  %v2479_v5 = vrot.slane %v2451_v35, %v5682_v2 }
 0x1ac   :  { %881 = vrot.lane.b32.xlu1 %v6599_v40, %s5212_s15  ;;  %v4548_v16 = vadd.f32 %v6603_v58, %v4352_v7  ;;  %v4353_v55 = vcombine.high %v4108_v9, %v4108_v9  ;;  %v5002_v33 = vpop.f32.mrb[3].mxu0  ;;  %v4549_v24 = vadd.f32 %v4451_v26, %v4108_v9  ;;  %v1855_v26 = vrot.slane %v1827_v3, %v5682_v2 }
 0x1ad   :  { %719 = vrot.lane.b32.xlu0 %v691_v54, %s5210_s13  ;;  %v1248_v54 = vsel %vm1228_vm7, %v1191_v36, %v778_v50  ;;  %v825_v50 = vshll.u32 %v6646_v31, 16  ;;  %v3136_v46 = vrot.slane %v4927_v13, %v5682_v2 }
 0x1ae   :  { %v874_v47 = vpop.permute.xlu1 %873  ;;  %v4741_v15 = vcombine.low %v4547_v10, %v4548_v16  ;;  %v4550_v22 = vadd.f32 %v6611_v51, %v4353_v55  ;;  %v3121_v21 = vcombine.low %v1841_v43, %v1855_v26  ;;  %v823_v16 = vshrl.u32 %v6646_v31, 16 }
 0x1af   :  { %v848_v61 = vpop.permute.xlu0 %847  ;;  %v827_v55 = vrot.slane %v825_v50, 1 }
 0x1b0   :  { %939 = vrot.lane.b32.xlu1 %v692_v19, %s5214_s18  ;;  %4837 = vst [vmem:[%s7420_s3] sm:$0xff] %v4741_v15  ;;  %v4742_v1 = vcombine.low %v4549_v24, %v4550_v22  ;;  %v1305_v57 = vsel %vm1285_vm8, %v1248_v54, %v848_v61  ;;  %v3143_v33 = vrot.slane %v3121_v21, %v5682_v2 }
 0x1b1   :  { %785 = vrot.lane.b32.xlu0 %v6584_v49, %s5211_s14  ;;  %v1103_v49 = vsel %vm1057_vm4, %v1046_v56, %v6540_v11  ;;  %v828_v36 = vor.u32 %v827_v55, %v823_v16 }
 0x1b2   :  { %v906_v62 = vpop.permute.xlu1 %905  ;;  %4838 = vst [vmem:[%s7420_s3 + $0x8] sm:$0xff] %v4742_v1  ;;  %v1160_v32 = vsel %vm1114_vm5, %v1103_v49, %v6573_v23 }
 0x1b3   :  { %v1362_v45 = vsel %vm1342_vm9, %v1305_v57, %v906_v62  ;;  %v6656_v60 = vpop.permute.xlu0 %519  ;;  %v1217_v7 = vsel %vm1171_vm6, %v1160_v32, %v6588_v12  ;;  %v886_v57 = vrot.slane %v6646_v31, 1 }
 0x1b4   :  { %v6661_v25 = vrot.slane %v1362_v45, %v5682_v2  ;;  %855 = vrot.lane.b32.xlu1 %v821_v18, %s5212_s15  ;;  %v1274_v23 = vsel %vm1228_vm7, %v1217_v7, %v804_v34  ;;  %v2481_v34 = vcombine.high %v6526_v30, %v6526_v30  ;;  %v1859_v61 = vcombine.high %v1362_v45, %v1362_v45 }
 0x1b5   :  { %469 = vrot.lane.b32.xlu0 %v6474_v44, %s5206_s26  ;;  %v3129_v44 = vrot.slane %v3119_v27, %v5682_v2  ;;  %v1331_v17 = vsel %vm1285_vm8, %v1274_v23, %v874_v47  ;;  %v5195_v27 = vld [vmem:[%s7417_s0 + $0x50] sm:$0xff]  }
 0x1b6   :  { %v6674_v11 = vrot.slane %v6661_v25, %v5682_v2  ;;  %v6676_v14 = vpop.permute.xlu1 %585  ;;  %v3707_v18 = vcombine.low %v2479_v5, %v2481_v34  ;;  %v1873_v26 = vrot.slane %v1859_v61, %v5682_v2  ;;  %v6759_v61 = vld [vmem:[%s7419_s2 + $0x10] sm:$0xff] }
 0x1b7   :  { %v932_v9 = vpop.permute.xlu0 %931  ;;  %v3151_v24 = vcombine.low %v3129_v44, %v3136_v46 }
 0x1b8   :  { %913 = vrot.lane.b32.xlu1 %v885_v53, %s5214_s18  ;;  %v3122_v12 = vcombine.low %v1857_v29, %v6674_v11  ;;  %v1388_v41 = vsel %vm1342_vm9, %v1331_v17, %v932_v9  ;;  %v1875_v29 = vcombine.high %v1873_v26, %v1873_v26  ;;  %v1889_v9 = vrot.slane %v1873_v26, %v5682_v2 }
 0x1b9   :  { %553 = vrot.lane.b32.xlu0 %v6514_v28, %s5207_s10  ;;  %v2483_v47 = vcombine.high %v1388_v41, %v1388_v41  ;;  %v2490_v3 = vrot.slane %v1388_v41, %v5682_v2  ;;  %v3159_v0 = vrot.slane %v3151_v24, %v5682_v2 }
 0x1ba   :  { %v656_v10 = vpop.permute.xlu1 %655  ;;  %v3150_v20 = vrot.slane %v3122_v12, %v5682_v2 }
 0x1bb   :  { %v6695_v15 = vpop.permute.xlu0 %545  ;;  %v2497_v30 = vrot.slane %v2483_v47, %v5682_v2  ;;  %v2498_v22 = vcombine.high %v2490_v3, %v2490_v3  ;;  %v2506_v1 = vrot.slane %v2490_v3, %v5682_v2 }
 0x1bc   :  { %689 = vrot.lane.b32.xlu1 %v6599_v40, %s5208_s11  ;;  %v3152_v28 = vcombine.low %v3143_v33, %v3150_v20  ;;  %v1874_v40 = vcombine.high %v6661_v25, %v6661_v25  ;;  %v3717_v25 = vrot.slane %v3707_v18, %v5682_v2  ;;  %v1903_v33 = vrot.slane %v1875_v29, %v5682_v2 }
 0x1bd   :  { %619 = vrot.lane.b32.xlu0 %v6550_v37, %s5209_s12  ;;  %v2499_v54 = vcombine.high %v2497_v30, %v2497_v30  ;;  %v2520_v39 = vrot.slane %v2498_v22, %v5682_v2  ;;  %v6714_v62 = vrot.slane %v2497_v30, %v5682_v2  ;;  %v1904_v20 = vcombine.high %v6674_v11, %v6674_v11  ;;  %v5196_v11 = vld [vmem:[%s7417_s0 + $0xc8] sm:$0xff]  }
 0x1be   :  { %v714_v4 = vpop.permute.xlu1 %713  ;;  %v3166_v48 = vrot.slane %v3152_v28, %v5682_v2  ;;  %v1896_v37 = vrot.slane %v1874_v40, %v5682_v2  ;;  %v6772_v40 = vld [vmem:[%s7419_s2 + $0x18] sm:$0xff] }
 0x1bf   :  { %v6704_v8 = vpop.permute.xlu0 %611  ;;  %v2527_v53 = vrot.slane %v2499_v54, %v5682_v2  ;;  %v3708_v56 = vcombine.low %v2506_v1, %v2520_v39  ;;  %v4934_v43 = vcombine.high %v2506_v1, %v2520_v39 }
 0x1c0   :  { %813 = vrot.lane.b32.xlu1 %v6646_v31, %s5211_s14  ;;  %v3167_v49 = vcombine.low %v3159_v0, %v3166_v48  ;;  %v7432_v31 = vld [vmem:[#allocation3_spill] sm:$0xff]  ;;  %v1906_v41 = vcombine.high %v1896_v37, %v1896_v37  ;;  %v3168_v18 = vcombine.low %v1896_v37, %v1904_v20 }
 0x1c1   :  { %747 = vrot.lane.b32.xlu0 %v692_v19, %s5210_s13  ;;  %v965_v13 = vsel %vm943_vm2, %v5195_v27, %v7432_v31  ;;  %v3710_v32 = vcombine.low %v6714_v62, %v2527_v53  ;;  %v3724_v35 = vrot.slane %v3708_v56, %v5682_v2  ;;  %v3731_v50 = vrot.slane %v4934_v43, %v5682_v2 }
 0x1c2   :  { %v780_v45 = vpop.permute.xlu1 %779  ;;  %v1022_v19 = vsel %vm1000_vm3, %v965_v13, %v6656_v60  ;;  %5028 = vmatmul.mubr.msk.bf16.gmra.mrb[28].mxu0 %vm3991_vm10, %v3167_v49  ;;  %v3169_v30 = vcombine.low %v1906_v41, %v1889_v9  ;;  %v6795_v31 = vcombine.high %v6772_v40, %v6772_v40  ;;  %v3178_v13 = vrot.slane %v3168_v18, %v5682_v2 }
 0x1c3   :  { %v682_v7 = vpop.permute.xlu0 %681  ;;  %v3738_v21 = vrot.slane %v3710_v32, %v5682_v2  ;;  %v3739_v23 = vcombine.low %v3717_v25, %v3724_v35  ;;  %5031 = vmatprep.mubr.msk.bf16.mxu0 %vm5215_vm1, %v7430_v6  ;;  %v1079_v60 = vsel %vm1057_vm4, %v1022_v19, %v6676_v14  ;;  %v1905_v14 = vcombine.high %v1889_v9, %v1889_v9 }
 0x1c4   :  { %941 = vrot.lane.b32.xlu1 %v886_v57, %s5214_s18  ;;  %v1136_v17 = vsel %vm1114_vm5, %v1079_v60, %v656_v10  ;;  %v6782_v57 = vcombine.high %v6759_v61, %v6759_v61 }
 0x1c5   :  { %883 = vrot.lane.b32.xlu0 %v828_v36, %s5212_s15  ;;  %v3740_v46 = vcombine.low %v3731_v50, %v3738_v21  ;;  %v1193_v5 = vsel %vm1171_vm6, %v1136_v17, %v714_v4  ;;  %v3747_v16 = vrot.slane %v3739_v23, %v5682_v2  ;;  %v7433_v4 = vld [vmem:[#allocation6_spill] sm:$0xff]  ;;  %v3170_v54 = vcombine.low %v1903_v33, %v1905_v14 }
 0x1c6   :  { %v850_v44 = vpop.permute.xlu1 %849  ;;  %v1250_v34 = vsel %vm1228_vm7, %v1193_v5, %v780_v45  ;;  %v991_v36 = vsel %vm943_vm2, %v5196_v11, %v7433_v4 }
 0x1c7   :  { %v740_v12 = vpop.permute.xlu0 %739  ;;  %v3754_v55 = vrot.slane %v3740_v46, %v5682_v2  ;;  %v1307_v47 = vsel %vm1285_vm8, %v1250_v34, %v850_v44  ;;  %v1048_v1 = vsel %vm1000_vm3, %v991_v36, %v6695_v15  ;;  %v3185_v15 = vrot.slane %v3169_v30, %v5682_v2 }
 0x1c8   :  { %v1105_v48 = vsel %vm1057_vm4, %v1048_v1, %v6704_v8  ;;  %v3192_v32 = vrot.slane %v3170_v54, %v5682_v2 }
 0x1c9   :  { %v3755_v24 = vcombine.low %v3747_v16, %v3754_v55  ;;  %v1162_v56 = vsel %vm1114_vm5, %v1105_v48, %v682_v7  ;;  %v3200_v17 = vcombine.low %v3178_v13, %v3185_v15 }
 0x1ca   :  { %v908_v3 = vpop.permute.xlu1 %907  ;;  %v1219_v49 = vsel %vm1171_vm6, %v1162_v56, %v740_v12 }
 0x1cb   :  { %v6752_v10 = vsel %vm1342_vm9, %v1307_v47, %v908_v3  ;;  %v806_v28 = vpop.permute.xlu0 %805  ;;  %5076 = vmatmul.mubr.msk.bf16.gmra.mrb[24].mxu1 %vm3991_vm10, %v3755_v24  ;;  %v2529_v24 = vcombine.high %v6714_v62, %v6714_v62 }
 0x1cc   :  { %v1914_v22 = vrot.slane %v6752_v10, %v5682_v2  ;;  %5079 = vmatprep.mubr.msk.bf16.mxu1 %vm5215_vm1, %v7430_v6  ;;  %v4113_v45 = vpop.f32.mrb[4].mxu0  ;;  %v1276_v35 = vsel %vm1228_vm7, %v1219_v49, %v806_v28  ;;  %v3208_v28 = vrot.slane %v3200_v17, %v5682_v2 }
 0x1cd   :  { %v4354_v27 = vcombine.high %v4113_v45, %v4113_v45  ;;  %v5005_v8 = vpop.f32.mrb[5].mxu0  ;;  %v4551_v19 = vadd.f32 %v6759_v61, %v4113_v45  ;;  %v1907_v45 = vcombine.high %v6752_v10, %v6752_v10 }
 0x1ce   :  { %v1922_v39 = vcombine.high %v1914_v22, %v1914_v22  ;;  %v6774_v0 = vpop.permute.xlu1 %521  ;;  %v6787_v43 = vrot.slane %v1914_v22, %v5682_v2  ;;  %v4116_v7 = vpop.f32.mrb[6].mxu0 }
 0x1cf   :  { %v876_v53 = vpop.permute.xlu0 %875  ;;  %v4552_v50 = vadd.f32 %v6782_v57, %v4354_v27  ;;  %v4355_v21 = vcombine.high %v4116_v7, %v4116_v7  ;;  %v5006_v23 = vpop.f32.mrb[7].mxu0  ;;  %v4553_v44 = vadd.f32 %v6772_v40, %v4116_v7 }
 0x1d0   :  { %v6790_v26 = vrot.slane %v1922_v39, %v5682_v2  ;;  %v1333_v29 = vsel %vm1285_vm8, %v1276_v35, %v876_v53 }
 0x1d1   :  { %v4743_v12 = vcombine.low %v4551_v19, %v4552_v50  ;;  %v4554_v41 = vadd.f32 %v6795_v31, %v4355_v21 }
 0x1d2   :  { %v3171_v25 = vcombine.low %v6787_v43, %v6790_v26  ;;  %v6802_v37 = vpop.permute.xlu1 %587 }
 0x1d3   :  { %v934_v9 = vpop.permute.xlu0 %933  ;;  %4839 = vst [vmem:[%s7420_s3 + $0x10] sm:$0xff] %v4743_v12  ;;  %v4744_v33 = vcombine.low %v4553_v44, %v4554_v41  ;;  %v5197_v41 = vld [vmem:[%s7417_s0 + $0x58] sm:$0xff]  }
 0x1d4   :  { %v3199_v60 = vrot.slane %v3171_v25, %v5682_v2  ;;  %v1390_v46 = vsel %vm1342_vm9, %v1333_v29, %v934_v9 }
 0x1d5   :  { %v2531_v5 = vcombine.high %v1390_v46, %v1390_v46  ;;  %v2538_v34 = vrot.slane %v1390_v46, %v5682_v2  ;;  %4840 = vst [vmem:[%s7420_s3 + $0x18] sm:$0xff] %v4744_v33 }
 0x1d6   :  { %v3201_v16 = vcombine.low %v3192_v32, %v3199_v60  ;;  %v658_v55 = vpop.permute.xlu1 %657  ;;  %v1921_v60 = vrot.slane %v1907_v45, %v5682_v2 }
 0x1d7   :  { %v2545_v20 = vrot.slane %v2531_v5, %v5682_v2  ;;  %v2546_v14 = vcombine.high %v2538_v34, %v2538_v34  ;;  %v2554_v47 = vrot.slane %v2538_v34, %v5682_v2  ;;  %v6817_v3 = vpop.permute.xlu0 %547  ;;  %v7434_v5 = vld [vmem:[#allocation2_spill] sm:$0xff] }
 0x1d8   :  { %v3215_v30 = vrot.slane %v3201_v16, %v5682_v2  ;;  %v967_v34 = vsel %vm943_vm2, %v5197_v41, %v7434_v5  ;;  %v1923_v16 = vcombine.high %v1921_v60, %v1921_v60 }
 0x1d9   :  { %v2547_v22 = vcombine.high %v2545_v20, %v2545_v20  ;;  %v2561_v11 = vrot.slane %v2545_v20, %v5682_v2  ;;  %v2568_v4 = vrot.slane %v2546_v14, %v5682_v2  ;;  %v2576_v36 = vcombine.high %v2554_v47, %v2554_v47 }
 0x1da   :  { %v3756_v18 = vcombine.low %v2529_v24, %v2554_v47  ;;  %v716_v54 = vpop.permute.xlu1 %715  ;;  %v3216_v1 = vcombine.low %v3208_v28, %v3215_v30  ;;  %v4209_v15 = vpop.f32.mrb[0].mxu1  ;;  %v1024_v33 = vsel %vm1000_vm3, %v967_v34, %v6774_v0  ;;  %v1951_v30 = vrot.slane %v1923_v16, %v5682_v2 }
 0x1db   :  { %v2575_v39 = vrot.slane %v2547_v22, %v5682_v2  ;;  %v2577_v62 = vcombine.high %v2561_v11, %v2561_v11  ;;  %v2578_v48 = vcombine.high %v2568_v4, %v2568_v4  ;;  %v3757_v53 = vcombine.low %v2568_v4, %v2576_v36  ;;  %v6829_v56 = vpop.permute.xlu0 %613  ;;  %v5053_v8 = vpop.f32.mrb[1].mxu1 }
 0x1dc   :  { %v4378_v49 = vcombine.high %v4209_v15, %v4209_v15  ;;  %v6834_v27 = vadd.f32 %v6611_v51, %v4209_v15  ;;  %5032 = vmatmul.mubr.msk.bf16.gmra.mrb[32].mxu0 %vm3991_vm10, %v3216_v1  ;;  %v3766_v32 = vrot.slane %v3756_v18, %v5682_v2  ;;  %v6839_v7 = vpop.f32.mrb[2].mxu1  ;;  %v1081_v14 = vsel %vm1057_vm4, %v1024_v33, %v6802_v37  ;;  %v6896_v15 = vld [vmem:[%s7419_s2 + $0x28] sm:$0xff] }
 0x1dd   :  { %v3758_v13 = vcombine.low %v2578_v48, %v2561_v11  ;;  %v3759_v25 = vcombine.low %v2575_v39, %v2577_v62  ;;  %v3773_v35 = vrot.slane %v3757_v53, %v5682_v2  ;;  %5035 = vmatprep.mubr.msk.bf16.mxu0 %vm5215_vm1, %v7430_v6  ;;  %v4601_v51 = vadd.f32 %v6782_v57, %v6839_v7  ;;  %v5054_v19 = vpop.f32.mrb[3].mxu1 }
 0x1de   :  { %v4600_v10 = vadd.f32 %v6759_v61, %v4378_v49  ;;  %v782_v50 = vpop.permute.xlu1 %781  ;;  %v1138_v24 = vsel %vm1114_vm5, %v1081_v14, %v658_v55  ;;  %v1937_v11 = vrot.slane %v1921_v60, %v5682_v2  ;;  %v4928_v39 = vcombine.high %v6787_v43, %v6790_v26  ;;  %v7435_v14 = vld [vmem:[#allocation8_spill] sm:$0xff] }
 0x1df   :  { %v3780_v21 = vrot.slane %v3758_v13, %v5682_v2  ;;  %v3787_v23 = vrot.slane %v3759_v25, %v5682_v2  ;;  %v3788_v29 = vcombine.low %v3766_v32, %v3773_v35  ;;  %v6848_v9 = vpop.permute.xlu0 %683  ;;  %v1195_v22 = vsel %vm1171_vm6, %v1138_v24, %v716_v54  ;;  %v6888_v54 = vld [vmem:[%s7419_s2 + $0x20] sm:$0xff] }
 0x1e0   :  { %v4767_v44 = vcombine.low %v4600_v10, %v4601_v51  ;;  %v1252_v0 = vsel %vm1228_vm7, %v1195_v22, %v782_v50  ;;  %v3218_v18 = vcombine.low %v1937_v11, %v1951_v30  ;;  %v1953_v45 = vcombine.high %v1937_v11, %v1937_v11 }
 0x1e1   :  { %v3789_v46 = vcombine.low %v3780_v21, %v3787_v23  ;;  %v3796_v17 = vrot.slane %v3788_v29, %v5682_v2  ;;  %v6902_v8 = vcombine.high %v6888_v54, %v6888_v54  ;;  %v6910_v51 = vcombine.high %v6896_v15, %v6896_v15 }
 0x1e2   :  { %4864 = vst [vmem:[%s7420_s3 + $0xd8] sm:$0xff] %v4767_v44  ;;  %v6854_v61 = vpop.permute.xlu1 %741  ;;  %v3234_v13 = vrot.slane %v3218_v18, %v5682_v2  ;;  %v3227_v19 = vrot.slane %v4928_v39, %v5682_v2 }
 0x1e3   :  { %v6856_v57 = vpop.permute.xlu0 %465  ;;  %v3803_v12 = vrot.slane %v3789_v46, %v5682_v2 }
 0x1e5   :  { %v3804_v20 = vcombine.low %v3796_v17, %v3803_v12  ;;  %v3249_v12 = vcombine.low %v3227_v19, %v3234_v13 }
 0x1e6   :  { %v6869_v47 = vpop.permute.xlu1 %549 }
 0x1e7   :  { %5080 = vmatmul.mubr.msk.bf16.gmra.mrb[28].mxu1 %vm3991_vm10, %v3804_v20  ;;  %v852_v28 = vpop.permute.xlu0 %851  ;;  %v5198_v20 = vld [vmem:[%s7417_s0 + $0xd0] sm:$0xff]  }
 0x1e8   :  { %5083 = vmatprep.mubr.msk.bf16.mxu1 %vm5215_vm1, %v7430_v6  ;;  %v1309_v37 = vsel %vm1285_vm8, %v1252_v0, %v852_v28  ;;  %v993_v24 = vsel %vm943_vm2, %v5198_v20, %v7435_v14 }
 0x1e9   :  { %v1050_v22 = vsel %vm1000_vm3, %v993_v24, %v6817_v3 }
 0x1ea   :  { %v910_v4 = vpop.permute.xlu1 %909 }
 0x1eb   :  { %v6881_v36 = vsel %vm1342_vm9, %v1309_v37, %v910_v4  ;;  %v808_v55 = vpop.permute.xlu0 %807  ;;  %v1107_v37 = vsel %vm1057_vm4, %v1050_v22, %v6829_v56  ;;  %v3257_v4 = vrot.slane %v3249_v12, %v5682_v2 }
 0x1ec   :  { %v1962_v1 = vrot.slane %v6881_v36, %v5682_v2 }
 0x1ee   :  { %v1970_v62 = vcombine.high %v1962_v1, %v1962_v1  ;;  %v1978_v48 = vrot.slane %v1962_v1, %v5682_v2  ;;  %v878_v53 = vpop.permute.xlu1 %877  ;;  %v1164_v1 = vsel %vm1114_vm5, %v1107_v37, %v6848_v9 }
 0x1ef   :  { %v6898_v49 = vpop.permute.xlu0 %615  ;;  %v4121_v25 = vpop.f32.mrb[8].mxu0  ;;  %v1221_v3 = vsel %vm1171_vm6, %v1164_v1, %v6854_v61  ;;  %v1955_v61 = vcombine.high %v6881_v36, %v6881_v36 }
 0x1f0   :  { %v6906_v43 = vrot.slane %v1970_v62, %v5682_v2  ;;  %v2000_v26 = vcombine.high %v1978_v48, %v1978_v48  ;;  %v3219_v32 = vcombine.low %v1953_v45, %v1978_v48  ;;  %v4356_v35 = vcombine.high %v4121_v25, %v4121_v25  ;;  %v5009_v10 = vpop.f32.mrb[9].mxu0 }
 0x1f1   :  { %v4124_v21 = vpop.f32.mrb[10].mxu0  ;;  %v4555_v29 = vadd.f32 %v6888_v54, %v4121_v25  ;;  %v1278_v48 = vsel %vm1228_vm7, %v1221_v3, %v808_v55  ;;  %v5199_v10 = vld [vmem:[%s7417_s0 + $0xd8] sm:$0xff]  }
 0x1f2   :  { %v3220_v50 = vcombine.low %v6906_v43, %v2000_v26  ;;  %v686_v23 = vpop.permute.xlu1 %685  ;;  %v4556_v60 = vadd.f32 %v6902_v8, %v4356_v35  ;;  %v4357_v44 = vcombine.high %v4124_v21, %v4124_v21  ;;  %v5010_v46 = vpop.f32.mrb[11].mxu0  ;;  %v3241_v41 = vrot.slane %v3219_v32, %v5682_v2 }
 0x1f3   :  { %v6916_v17 = vpop.permute.xlu0 %523  ;;  %v4557_v16 = vadd.f32 %v6896_v15, %v4124_v21  ;;  %v1335_v45 = vsel %vm1285_vm8, %v1278_v48, %v878_v53  ;;  %v995_v19 = vsel %vm943_vm2, %v5199_v10, %v6856_v57 }
 0x1f4   :  { %v3248_v5 = vrot.slane %v3220_v50, %v5682_v2  ;;  %v4745_v34 = vcombine.low %v4555_v29, %v4556_v60  ;;  %v4558_v33 = vadd.f32 %v6910_v51, %v4357_v44  ;;  %v1969_v50 = vrot.slane %v1955_v61, %v5682_v2 }
 0x1f5   :  { %v4379_v29 = vcombine.high %v6839_v7, %v6839_v7  ;;  %v1052_v36 = vsel %vm1000_vm3, %v995_v19, %v6869_v47  ;;  %v5200_v7 = vld [vmem:[%s7417_s0 + $0x60] sm:$0xff]  }
 0x1f6   :  { %v3250_v28 = vcombine.low %v3241_v41, %v3248_v5  ;;  %v6927_v30 = vpop.permute.xlu1 %589  ;;  %4841 = vst [vmem:[%s7420_s3 + $0x20] sm:$0xff] %v4745_v34  ;;  %v4746_v0 = vcombine.low %v4557_v16, %v4558_v33  ;;  %v1109_v44 = vsel %vm1057_vm4, %v1052_v36, %v6898_v49  ;;  %v1971_v5 = vcombine.high %v1969_v50, %v1969_v50  ;;  %v7436_v16 = vld [vmem:[#allocation5_spill] sm:$0xff] }
 0x1f7   :  { %v936_v11 = vpop.permute.xlu0 %935  ;;  %v1166_v12 = vsel %vm1114_vm5, %v1109_v44, %v686_v23  ;;  %v969_v47 = vsel %vm943_vm2, %v5200_v7, %v7436_v16  ;;  %v4602_v33 = vadd.f32 %v6772_v40, %v4379_v29  ;;  %v1985_v23 = vrot.slane %v1969_v50, %v5682_v2  ;;  %v7027_v29 = vld [vmem:[%s7419_s2 + $0x30] sm:$0xff] }
 0x1f8   :  { %v3264_v18 = vrot.slane %v3250_v28, %v5682_v2  ;;  %4842 = vst [vmem:[%s7420_s3 + $0x28] sm:$0xff] %v4746_v0  ;;  %v1392_v13 = vsel %vm1342_vm9, %v1335_v45, %v936_v11  ;;  %v1999_v1 = vrot.slane %v1971_v5, %v5682_v2  ;;  %v1026_v45 = vsel %vm1000_vm3, %v969_v47, %v6916_v17 }
 0x1f9   :  { %v2579_v25 = vcombine.high %v1392_v13, %v1392_v13  ;;  %v2586_v32 = vrot.slane %v1392_v13, %v5682_v2  ;;  %v7045_v16 = vcombine.high %v7027_v29, %v7027_v29 }
 0x1fa   :  { %v6945_v39 = vpop.permute.xlu1 %659  ;;  %v3265_v62 = vcombine.low %v3257_v4, %v3264_v18 }
 0x1fb   :  { %v744_v56 = vpop.permute.xlu0 %743  ;;  %v2593_v53 = vrot.slane %v2579_v25, %v5682_v2  ;;  %v2594_v21 = vcombine.high %v2586_v32, %v2586_v32  ;;  %v2602_v14 = vrot.slane %v2586_v32, %v5682_v2  ;;  %v2001_v32 = vcombine.high %v1985_v23, %v1985_v23 }
 0x1fc   :  { %5036 = vmatmul.mubr.msk.bf16.gmra.mrb[36].mxu0 %vm3991_vm10, %v3265_v62  ;;  %v1223_v34 = vsel %vm1171_vm6, %v1166_v12, %v744_v56 }
 0x1fd   :  { %5039 = vmatprep.mubr.msk.bf16.mxu0 %vm5215_vm1, %v7430_v6  ;;  %v2595_v41 = vcombine.high %v2593_v53, %v2593_v53  ;;  %v2616_v57 = vrot.slane %v2594_v21, %v5682_v2  ;;  %v2609_v24 = vrot.slane %v2593_v53, %v5682_v2  ;;  %v1083_v53 = vsel %vm1057_vm4, %v1026_v45, %v6927_v30 }
 0x1fe   :  { %v6953_v9 = vpop.permute.xlu1 %467  ;;  %v1140_v19 = vsel %vm1114_vm5, %v1083_v53, %v6945_v39 }
 0x1ff   :  { %v810_v26 = vpop.permute.xlu0 %809  ;;  %v2623_v11 = vrot.slane %v2595_v41, %v5682_v2  ;;  %v3805_v3 = vcombine.low %v2602_v14, %v2616_v57  ;;  %v4935_v62 = vcombine.high %v2602_v14, %v2616_v57  ;;  %v3267_v41 = vcombine.low %v1999_v1, %v2001_v32 }
 0x200   :  { %v1280_v49 = vsel %vm1228_vm7, %v1223_v34, %v810_v26 }
 0x201   :  { %v3822_v21 = vrot.slane %v4935_v62, %v5682_v2 }
 0x202   :  { %v880_v55 = vpop.permute.xlu1 %879 }
 0x203   :  { %v718_v35 = vpop.permute.xlu0 %717  ;;  %v1337_v28 = vsel %vm1285_vm8, %v1280_v49, %v880_v55  ;;  %v2002_v55 = vcombine.high %v6906_v43, %v6906_v43  ;;  %v3815_v43 = vrot.slane %v3805_v3, %v5682_v2 }
 0x204   :  { %v1197_v30 = vsel %vm1171_vm6, %v1140_v19, %v718_v35  ;;  %v7038_v35 = vld [vmem:[%s7419_s2 + $0x38] sm:$0xff]  ;;  %v5201_v19 = vld [vmem:[%s7417_s0 + $0xe0] sm:$0xff]  }
 0x205   :  { %v3266_v12 = vcombine.low %v2002_v55, %v1985_v23  ;;  %v3837_v47 = vcombine.low %v3815_v43, %v3822_v21 }
 0x206   :  { %v784_v60 = vpop.permute.xlu1 %783 }
 0x207   :  { %v6971_v46 = vpop.permute.xlu0 %551  ;;  %v1254_v36 = vsel %vm1228_vm7, %v1197_v30, %v784_v60  ;;  %v3845_v32 = vrot.slane %v3837_v47, %v5682_v2 }
 0x209   :  { %v4217_v22 = vpop.f32.mrb[4].mxu1 }
 0x20a   :  { %v6983_v20 = vpop.permute.xlu1 %617  ;;  %v4380_v37 = vcombine.high %v4217_v22, %v4217_v22  ;;  %v4603_v4 = vadd.f32 %v6795_v31, %v4217_v22  ;;  %v5057_v40 = vpop.f32.mrb[5].mxu1 }
 0x20b   :  { %v938_v0 = vpop.permute.xlu0 %937  ;;  %v6999_v56 = vpop.f32.mrb[6].mxu1 }
 0x20c   :  { %v6992_v18 = vsel %vm1342_vm9, %v1337_v28, %v938_v0  ;;  %v4604_v13 = vadd.f32 %v6888_v54, %v4380_v37  ;;  %v4768_v31 = vcombine.low %v4602_v33, %v4603_v4  ;;  %v4605_v26 = vadd.f32 %v6902_v8, %v6999_v56  ;;  %v5058_v25 = vpop.f32.mrb[7].mxu1 }
 0x20d   :  { %v6997_v48 = vrot.slane %v6992_v18, %v5682_v2  ;;  %v3807_v54 = vcombine.low %v2609_v24, %v2623_v11  ;;  %v2625_v8 = vcombine.high %v2609_v24, %v2609_v24  ;;  %v7050_v28 = vcombine.high %v7038_v35, %v7038_v35 }
 0x20e   :  { %v7006_v61 = vpop.permute.xlu1 %525  ;;  %4865 = vst [vmem:[%s7420_s3 + $0xe0] sm:$0xff] %v4768_v31  ;;  %v4769_v50 = vcombine.low %v4604_v13, %v4605_v26  ;;  %v3276_v0 = vrot.slane %v3266_v12, %v5682_v2  ;;  %v3283_v11 = vrot.slane %v3267_v41, %v5682_v2  ;;  %v2627_v37 = vcombine.high %v6992_v18, %v6992_v18 }
 0x20f   :  { %v7014_v10 = vrot.slane %v6997_v48, %v5682_v2  ;;  %v854_v17 = vpop.permute.xlu0 %853  ;;  %v3829_v34 = vrot.slane %v3807_v54, %v5682_v2  ;;  %v2642_v31 = vcombine.high %v6997_v48, %v6997_v48  ;;  %v997_v48 = vsel %vm943_vm2, %v5201_v19, %v6953_v9 }
 0x210   :  { %4866 = vst [vmem:[%s7420_s3 + $0xe8] sm:$0xff] %v4769_v50  ;;  %v1311_v5 = vsel %vm1285_vm8, %v1254_v36, %v854_v17 }
 0x211   :  { %v3808_v39 = vcombine.low %v2625_v8, %v7014_v10  ;;  %v2641_v8 = vrot.slane %v2627_v37, %v5682_v2  ;;  %v3365_v37 = vcombine.low %v5852_v42, %v5855_v63 }
 0x212   :  { %v912_v44 = vpop.permute.xlu1 %911 }
 0x213   :  { %v688_v57 = vpop.permute.xlu0 %687  ;;  %v3836_v60 = vrot.slane %v3808_v39, %v5682_v2  ;;  %v1368_v7 = vsel %vm1342_vm9, %v1311_v5, %v912_v44  ;;  %v4129_v33 = vpop.f32.mrb[12].mxu0  ;;  %v1054_v39 = vsel %vm1000_vm3, %v997_v48, %v6971_v46  ;;  %v2664_v44 = vrot.slane %v2642_v31, %v5682_v2 }
 0x214   :  { %v2010_v23 = vrot.slane %v1368_v7, %v5682_v2  ;;  %v4358_v14 = vcombine.high %v4129_v33, %v4129_v33  ;;  %v5013_v24 = vpop.f32.mrb[13].mxu0  ;;  %v4559_v3 = vadd.f32 %v7027_v29, %v4129_v33  ;;  %v2003_v12 = vcombine.high %v1368_v7, %v1368_v7 }
 0x215   :  { %v3838_v49 = vcombine.low %v3829_v34, %v3836_v60  ;;  %v4132_v4 = vpop.f32.mrb[14].mxu0  ;;  %v1111_v9 = vsel %vm1057_vm4, %v1054_v39, %v6983_v20  ;;  %v3298_v60 = vcombine.low %v3276_v0, %v3283_v11  ;;  %v4381_v46 = vcombine.high %v6999_v56, %v6999_v56  ;;  %v7437_v24 = vld [vmem:[#allocation4_spill] sm:$0xff] }
 0x216   :  { %v746_v22 = vpop.permute.xlu1 %745  ;;  %v2018_v1 = vcombine.high %v2010_v23, %v2010_v23  ;;  %v4560_v62 = vadd.f32 %v7045_v16, %v4358_v14  ;;  %v4359_v45 = vcombine.high %v4132_v4, %v4132_v4  ;;  %v5014_v13 = vpop.f32.mrb[15].mxu0  ;;  %v2026_v26 = vrot.slane %v2010_v23, %v5682_v2  ;;  %v5202_v14 = vld [vmem:[%s7417_s0 + $0x68] sm:$0xff]  }
 0x217   :  { %v7056_v40 = vpop.permute.xlu0 %591  ;;  %v4561_v25 = vadd.f32 %v7038_v35, %v4132_v4  ;;  %v3852_v54 = vrot.slane %v3838_v49, %v5682_v2  ;;  %v1168_v7 = vsel %vm1114_vm5, %v1111_v9, %v688_v57  ;;  %v2643_v20 = vcombine.high %v2641_v8, %v2641_v8 }
 0x218   :  { %v2040_v18 = vrot.slane %v2018_v1, %v5682_v2  ;;  %v4747_v55 = vcombine.low %v4559_v3, %v4560_v62  ;;  %v4562_v53 = vadd.f32 %v7050_v28, %v4359_v45  ;;  %v2657_v33 = vrot.slane %v2641_v8, %v5682_v2 }
 0x219   :  { %v3853_v36 = vcombine.low %v3845_v32, %v3852_v54  ;;  %v1225_v23 = vsel %vm1171_vm6, %v1168_v7, %v746_v22  ;;  %v971_v0 = vsel %vm943_vm2, %v5202_v14, %v7437_v24  ;;  %v2674_v56 = vcombine.high %v2664_v44, %v2664_v44 }
 0x21a   :  { %v812_v17 = vpop.permute.xlu1 %811  ;;  %v3268_v43 = vcombine.low %v2026_v26, %v2040_v18  ;;  %v4929_v21 = vcombine.high %v2026_v26, %v2040_v18  ;;  %4843 = vst [vmem:[%s7420_s3 + $0x30] sm:$0xff] %v4747_v55  ;;  %v4748_v30 = vcombine.low %v4561_v25, %v4562_v53  ;;  %v2017_v57 = vrot.slane %v2003_v12, %v5682_v2 }
 0x21b   :  { %v662_v50 = vpop.permute.xlu0 %661  ;;  %5084 = vmatmul.mubr.msk.bf16.gmra.mrb[32].mxu1 %vm3991_vm10, %v3853_v36  ;;  %v1282_v11 = vsel %vm1228_vm7, %v1225_v23, %v812_v17  ;;  %v3306_v22 = vrot.slane %v3298_v60, %v5682_v2  ;;  %v2672_v62 = vcombine.high %v7014_v10, %v7014_v10  ;;  %v4606_v45 = vadd.f32 %v6896_v15, %v4381_v46  ;;  %v7148_v60 = vld [vmem:[%s7419_s2 + $0x48] sm:$0xff] }
 0x21c   :  { %v3290_v41 = vrot.slane %v3268_v43, %v5682_v2  ;;  %v3297_v5 = vrot.slane %v4929_v21, %v5682_v2  ;;  %4844 = vst [vmem:[%s7420_s3 + $0x38] sm:$0xff] %v4748_v30  ;;  %5087 = vmatprep.mubr.msk.bf16.mxu1 %vm5215_vm1, %v7430_v6  ;;  %v1028_v13 = vsel %vm1000_vm3, %v971_v0, %v7006_v61 }
 0x21d   :  { %v2671_v42 = vrot.slane %v2643_v20, %v5682_v2  ;;  %v2673_v63 = vcombine.high %v2657_v33, %v2657_v33  ;;  %v3855_v53 = vcombine.low %v2674_v56, %v2657_v33  ;;  %v2019_v17 = vcombine.high %v2017_v57, %v2017_v57 }
 0x21e   :  { %v882_v34 = vpop.permute.xlu1 %881  ;;  %v3299_v49 = vcombine.low %v3290_v41, %v3297_v5  ;;  %v1085_v61 = vsel %vm1057_vm4, %v1028_v13, %v7056_v40  ;;  %v3854_v30 = vcombine.low %v2664_v44, %v2672_v62  ;;  %v2033_v44 = vrot.slane %v2017_v57, %v5682_v2 }
 0x21f   :  { %v720_v47 = vpop.permute.xlu0 %719  ;;  %v1339_v4 = vsel %vm1285_vm8, %v1282_v11, %v882_v34  ;;  %v1142_v36 = vsel %vm1114_vm5, %v1085_v61, %v662_v50  ;;  %v3856_v9 = vcombine.low %v2671_v42, %v2673_v63  ;;  %v7135_v50 = vld [vmem:[%s7419_s2 + $0x40] sm:$0xff]  ;;  %v2047_v46 = vrot.slane %v2019_v17, %v5682_v2 }
 0x220   :  { %v3313_v3 = vrot.slane %v3299_v49, %v5682_v2  ;;  %v1199_v41 = vsel %vm1171_vm6, %v1142_v36, %v720_v47  ;;  %v7156_v49 = vrot.slane %v3365_v37, %v5682_v2  ;;  %v3864_v23 = vrot.slane %v3854_v30, %v5682_v2 }
 0x221   :  { %v7165_v0 = vcombine.high %v7135_v50, %v7135_v50  ;;  %v3878_v56 = vrot.slane %v3856_v9, %v5682_v2  ;;  %v7171_v37 = vcombine.high %v7148_v60, %v7148_v60 }
 0x222   :  { %v940_v1 = vpop.permute.xlu1 %939  ;;  %v3314_v54 = vcombine.low %v3306_v22, %v3313_v3  ;;  %v2049_v22 = vcombine.high %v2033_v44, %v2033_v44 }
 0x223   :  { %v1396_v31 = vsel %vm1342_vm9, %v1339_v4, %v940_v1  ;;  %v786_v26 = vpop.permute.xlu0 %785  ;;  %v4225_v25 = vpop.f32.mrb[8].mxu1  ;;  %v5203_v4 = vld [vmem:[%s7417_s0 + $0xe8] sm:$0xff]  }
 0x224   :  { %v2682_v32 = vrot.slane %v1396_v31, %v5682_v2  ;;  %v4382_v18 = vcombine.high %v4225_v25, %v4225_v25  ;;  %v5061_v55 = vpop.f32.mrb[9].mxu1  ;;  %v4607_v10 = vadd.f32 %v6910_v51, %v4225_v25  ;;  %v2675_v19 = vcombine.high %v1396_v31, %v1396_v31  ;;  %5040 = vmatmul.mubr.msk.bf16.gmra.mrb[40].mxu0 %vm3991_vm10, %v3314_v54 }
 0x225   :  { %v7116_v15 = vpop.f32.mrb[10].mxu1  ;;  %5043 = vmatprep.mubr.msk.bf16.mxu0 %vm5215_vm1, %v7430_v6  ;;  %v1256_v5 = vsel %vm1228_vm7, %v1199_v41, %v786_v26 }
 0x226   :  { %v2690_v48 = vcombine.high %v2682_v32, %v2682_v32  ;;  %v4608_v8 = vadd.f32 %v7027_v29, %v4382_v18  ;;  %v856_v43 = vpop.permute.xlu1 %855  ;;  %v5062_v21 = vpop.f32.mrb[11].mxu1  ;;  %v4770_v39 = vcombine.low %v4606_v45, %v4607_v10  ;;  %v4609_v51 = vadd.f32 %v7045_v16, %v7116_v15 }
 0x227   :  { %v470_v12 = vpop.permute.xlu0 %469  ;;  %v7127_v40 = vrot.slane %v2682_v32, %v5682_v2  ;;  %v3871_v16 = vrot.slane %v3855_v53, %v5682_v2  ;;  %v2689_v7 = vrot.slane %v2675_v19, %v5682_v2  ;;  %v1313_v20 = vsel %vm1285_vm8, %v1256_v5, %v856_v43 }
 0x228   :  { %v7130_v29 = vrot.slane %v2690_v48, %v5682_v2  ;;  %4867 = vst [vmem:[%s7420_s3 + $0xf0] sm:$0xff] %v4770_v39  ;;  %v4771_v34 = vcombine.low %v4608_v8, %v4609_v51  ;;  %v999_v1 = vsel %vm943_vm2, %v5203_v4, %v470_v12  ;;  %v3315_v45 = vcombine.low %v2033_v44, %v2047_v46 }
 0x229   :  { %v3886_v62 = vcombine.low %v3864_v23, %v3871_v16  ;;  %v2691_v13 = vcombine.high %v2689_v7, %v2689_v7  ;;  %v4383_v52 = vcombine.high %v7116_v15, %v7116_v15 }
 0x22a   :  { %v3857_v47 = vcombine.low %v7127_v40, %v7130_v29  ;;  %v914_v33 = vpop.permute.xlu1 %913  ;;  %4868 = vst [vmem:[%s7420_s3 + $0xf8] sm:$0xff] %v4771_v34 }
 0x22b   :  { %v1370_v14 = vsel %vm1342_vm9, %v1313_v20, %v914_v33  ;;  %v554_v24 = vpop.permute.xlu0 %553 }
 0x22c   :  { %v3885_v57 = vrot.slane %v3857_v47, %v5682_v2  ;;  %v2051_v11 = vcombine.high %v1370_v14, %v1370_v14  ;;  %v2058_v3 = vrot.slane %v1370_v14, %v5682_v2  ;;  %v1056_v26 = vsel %vm1000_vm3, %v999_v1, %v554_v24 }
 0x22d   :  { %v4137_v25 = vpop.f32.mrb[16].mxu0  ;;  %v3325_v14 = vrot.slane %v3315_v45, %v5682_v2  ;;  %v2719_v24 = vrot.slane %v2691_v13, %v5682_v2 }
 0x22e   :  { %v2065_v31 = vrot.slane %v2051_v11, %v5682_v2  ;;  %v690_v42 = vpop.permute.xlu1 %689  ;;  %v3887_v63 = vcombine.low %v3878_v56, %v3885_v57  ;;  %v2066_v32 = vcombine.high %v2058_v3, %v2058_v3  ;;  %v2074_v18 = vrot.slane %v2058_v3, %v5682_v2  ;;  %v5017_v53 = vpop.f32.mrb[17].mxu0 }
 0x22f   :  { %v4360_v55 = vcombine.high %v4137_v25, %v4137_v25  ;;  %v620_v17 = vpop.permute.xlu0 %619  ;;  %v4563_v61 = vadd.f32 %v7135_v50, %v4137_v25  ;;  %v4140_v48 = vpop.f32.mrb[18].mxu0  ;;  %v3894_v57 = vrot.slane %v3886_v62, %v5682_v2  ;;  %v2705_v11 = vrot.slane %v2689_v7, %v5682_v2 }
 0x230   :  { %v2067_v10 = vcombine.high %v2065_v31, %v2065_v31  ;;  %v2081_v54 = vrot.slane %v2065_v31, %v5682_v2  ;;  %v1113_v19 = vsel %vm1057_vm4, %v1056_v26, %v620_v17  ;;  %v2088_v8 = vrot.slane %v2066_v32, %v5682_v2  ;;  %v5018_v36 = vpop.f32.mrb[19].mxu0 }
 0x231   :  { %v2096_v43 = vcombine.high %v2074_v18, %v2074_v18  ;;  %v3316_v21 = vcombine.low %v2049_v22, %v2074_v18  ;;  %v4564_v30 = vadd.f32 %v7165_v0, %v4360_v55  ;;  %v1170_v12 = vsel %vm1114_vm5, %v1113_v19, %v690_v42 }
 0x232   :  { %v2095_v39 = vrot.slane %v2067_v10, %v5682_v2  ;;  %v2097_v51 = vcombine.high %v2081_v54, %v2081_v54  ;;  %v4361_v9 = vcombine.high %v4140_v48, %v4140_v48  ;;  %v814_v41 = vpop.permute.xlu1 %813  ;;  %v2098_v16 = vcombine.high %v2088_v8, %v2088_v8 }
 0x233   :  { %v3317_v44 = vcombine.low %v2088_v8, %v2096_v43  ;;  %v3332_v5 = vrot.slane %v3316_v21, %v5682_v2  ;;  %v4749_v34 = vcombine.low %v4563_v61, %v4564_v30  ;;  %v748_v46 = vpop.permute.xlu0 %747  ;;  %v4565_v20 = vadd.f32 %v7148_v60, %v4140_v48 }
 0x234   :  { %v3364_v47 = vcombine.low %v2095_v39, %v2097_v51  ;;  %v4566_v33 = vadd.f32 %v7171_v37, %v4361_v9  ;;  %v1227_v23 = vsel %vm1171_vm6, %v1170_v12, %v748_v46  ;;  %v3318_v56 = vcombine.low %v2098_v16, %v2081_v54 }
 0x235   :  { %4845 = vst [vmem:[%s7420_s3 + $0x40] sm:$0xff] %v4749_v34  ;;  %v3901_v22 = vrot.slane %v3887_v63, %v5682_v2  ;;  %v3339_v31 = vrot.slane %v3317_v44, %v5682_v2  ;;  %v3347_v13 = vcombine.low %v3325_v14, %v3332_v5  ;;  %v1284_v26 = vsel %vm1228_vm7, %v1227_v23, %v814_v41 }
 0x236   :  { %v3374_v4 = vrot.slane %v3364_v47, %v5682_v2  ;;  %v4750_v1 = vcombine.low %v4565_v20, %v4566_v33  ;;  %v942_v3 = vpop.permute.xlu1 %941  ;;  %v3346_v45 = vrot.slane %v3318_v56, %v5682_v2  ;;  %v3904_v32 = vcombine.low %v2705_v11, %v2719_v24 }
 0x237   :  { %v884_v25 = vpop.permute.xlu0 %883  ;;  %v3902_v62 = vcombine.low %v3894_v57, %v3901_v22  ;;  %v3411_v10 = vrot.slane %v3397_v38, %v5682_v2  ;;  %v4936_v54 = vcombine.high %v7127_v40, %v7130_v29  ;;  %v2721_v59 = vcombine.high %v2705_v11, %v2705_v11 }
 0x238   :  { %4846 = vst [vmem:[%s7420_s3 + $0x48] sm:$0xff] %v4750_v1  ;;  %v1341_v7 = vsel %vm1285_vm8, %v1284_v26, %v884_v25  ;;  %v3396_v42 = vcombine.low %v3374_v4, %v7156_v49  ;;  %v3348_v18 = vcombine.low %v3339_v31, %v3346_v45  ;;  %v3355_v49 = vrot.slane %v3347_v13, %v5682_v2  ;;  %v4461_v31 = vld [vmem:[%s7419_s2 + $0x58] sm:$0xff] }
 0x239   :  { %v1398_v63 = vsel %vm1342_vm9, %v1341_v7, %v942_v3  ;;  %5088 = vmatmul.mubr.msk.bf16.gmra.mrb[36].mxu1 %vm3991_vm10, %v3902_v62  ;;  %v3920_v21 = vrot.slane %v3904_v32, %v5682_v2  ;;  %v3913_v39 = vrot.slane %v4936_v54, %v5682_v2  ;;  %v4610_v5 = vadd.f32 %v7038_v35, %v4383_v52 }
 0x23a   :  { %v2723_v55 = vcombine.high %v1398_v63, %v1398_v63  ;;  %v2730_v53 = vrot.slane %v1398_v63, %v5682_v2  ;;  %v3404_v17 = vrot.slane %v3396_v42, %v5682_v2  ;;  %v3362_v61 = vrot.slane %v3348_v18, %v5682_v2  ;;  %5091 = vmatprep.mubr.msk.bf16.mxu1 %vm5215_vm1, %v7430_v6 }
 0x23b   :  { %v3935_v20 = vcombine.low %v3913_v39, %v3920_v21  ;;  %v4510_v7 = vcombine.high %v4461_v31, %v4461_v31 }
 0x23c   :  { %v2737_v19 = vrot.slane %v2723_v55, %v5682_v2  ;;  %v2738_v48 = vcombine.high %v2730_v53, %v2730_v53  ;;  %v2746_v8 = vrot.slane %v2730_v53, %v5682_v2  ;;  %v3412_v43 = vcombine.low %v3404_v17, %v3411_v10 }
 0x23d   :  { %v3363_v38 = vcombine.low %v3355_v49, %v3362_v61  ;;  %v3943_v22 = vrot.slane %v3935_v20, %v5682_v2 }
 0x23e   :  { %v2739_v40 = vcombine.high %v2737_v19, %v2737_v19  ;;  %v2753_v29 = vrot.slane %v2737_v19, %v5682_v2  ;;  %v2760_v30 = vrot.slane %v2738_v48, %v5682_v2  ;;  %v2768_v36 = vcombine.high %v2746_v8, %v2746_v8 }
 0x23f   :  { %v3905_v51 = vcombine.low %v2721_v59, %v2746_v8  ;;  %5044 = vmatmul.mubr.msk.bf16.gmra.mrb[44].mxu0 %vm3991_vm10, %v3363_v38  ;;  %v4233_v12 = vpop.f32.mrb[12].mxu1 }
 0x240   :  { %v2767_v9 = vrot.slane %v2739_v40, %v5682_v2  ;;  %v2769_v41 = vcombine.high %v2753_v29, %v2753_v29  ;;  %v2770_v16 = vcombine.high %v2760_v30, %v2760_v30  ;;  %v3906_v44 = vcombine.low %v2760_v30, %v2768_v36  ;;  %v5065_v15 = vpop.f32.mrb[13].mxu1  ;;  %5047 = vmatprep.mubr.msk.bf16.mxu0 %vm5215_vm1, %v7430_v6 }
 0x241   :  { %v4384_v34 = vcombine.high %v4233_v12, %v4233_v12  ;;  %v4611_v46 = vadd.f32 %v7050_v28, %v4233_v12  ;;  %v4236_v47 = vpop.f32.mrb[14].mxu1  ;;  %v3927_v33 = vrot.slane %v3905_v51, %v5682_v2  ;;  %v4460_v28 = vld [vmem:[%s7419_s2 + $0x50] sm:$0xff] }
 0x242   :  { %v3934_v23 = vrot.slane %v3906_v44, %v5682_v2  ;;  %v5066_v14 = vpop.f32.mrb[15].mxu1  ;;  %v4613_v57 = vadd.f32 %v7165_v0, %v4236_v47  ;;  %v3952_v4 = vcombine.low %v2770_v16, %v2753_v29  ;;  %v3953_v1 = vcombine.low %v2767_v9, %v2769_v41 }
 0x243   :  { %v4612_v24 = vadd.f32 %v7135_v50, %v4384_v34  ;;  %v4772_v56 = vcombine.low %v4610_v5, %v4611_v46  ;;  %v4509_v13 = vcombine.high %v4460_v28, %v4460_v28 }
 0x244   :  { %v3936_v11 = vcombine.low %v3927_v33, %v3934_v23  ;;  %v3960_v50 = vrot.slane %v3952_v4, %v5682_v2  ;;  %v3967_v45 = vrot.slane %v3953_v1, %v5682_v2 }
 0x245   :  { %4869 = vst [vmem:[%s7420_s3 + $0x100] sm:$0xff] %v4772_v56  ;;  %v4773_v35 = vcombine.low %v4612_v24, %v4613_v57 }
 0x246   :  { %v3950_v3 = vrot.slane %v3936_v11, %v5682_v2  ;;  %v3968_v32 = vcombine.low %v3960_v50, %v3967_v45 }
 0x247   :  { %4870 = vst [vmem:[%s7420_s3 + $0x108] sm:$0xff] %v4773_v35  ;;  %5048 = vmatmul.mubr.msk.bf16.gmra.mrb[48].mxu0 %vm3991_vm10, %v3412_v43 }
 0x248   :  { %v3951_v0 = vcombine.low %v3943_v22, %v3950_v3  ;;  %v3975_v49 = vrot.slane %v3968_v32, %v5682_v2  ;;  %v4464_v22 = vld [vmem:[%s7419_s2 + $0x70] sm:$0xff]  ;;  %v4465_v3 = vld [vmem:[%s7419_s2 + $0x78] sm:$0xff] }
 0x249   :  { %v4145_v26 = vpop.f32.mrb[20].mxu0  ;;  %v4513_v50 = vcombine.high %v4464_v22, %v4464_v22 }
 0x24a   :  { %5092 = vmatmul.mubr.msk.bf16.gmra.mrb[40].mxu1 %vm3991_vm10, %v3951_v0  ;;  %v4362_v25 = vcombine.high %v4145_v26, %v4145_v26  ;;  %v5021_v62 = vpop.f32.mrb[21].mxu0  ;;  %v4567_v63 = vadd.f32 %v4460_v28, %v4145_v26 }
 0x24b   :  { %5095 = vmatprep.mubr.msk.bf16.mxu1 %vm5215_vm1, %v7430_v6  ;;  %v4148_v42 = vpop.f32.mrb[22].mxu0  ;;  %v4385_v6 = vcombine.high %v4236_v47, %v4236_v47 }
 0x24c   :  { %v4568_v18 = vadd.f32 %v4509_v13, %v4362_v25  ;;  %v4363_v55 = vcombine.high %v4148_v42, %v4148_v42  ;;  %v5022_v53 = vpop.f32.mrb[23].mxu0  ;;  %v4569_v10 = vadd.f32 %v4461_v31, %v4148_v42 }
 0x24d   :  { %v4614_v48 = vadd.f32 %v7148_v60, %v4385_v6  ;;  %v4462_v60 = vld [vmem:[%s7419_s2 + $0x60] sm:$0xff] }
 0x24e   :  { %v4751_v17 = vcombine.low %v4567_v63, %v4568_v18  ;;  %v4570_v54 = vadd.f32 %v4510_v7, %v4363_v55  ;;  %v4511_v30 = vcombine.high %v4462_v60, %v4462_v60 }
 0x250   :  { %4847 = vst [vmem:[%s7420_s3 + $0x50] sm:$0xff] %v4751_v17  ;;  %v4752_v61 = vcombine.low %v4569_v10, %v4570_v54 }
 0x252   :  { %5096 = vmatmul.mubr.msk.bf16.gmra.mrb[44].mxu1 %vm3991_vm10, %v3975_v49  ;;  %4848 = vst [vmem:[%s7420_s3 + $0x58] sm:$0xff] %v4752_v61 }
 0x260   :  { %v4241_v19 = vpop.f32.mrb[16].mxu1 }
 0x261   :  { %v4386_v8 = vcombine.high %v4241_v19, %v4241_v19  ;;  %v4615_v43 = vadd.f32 %v7171_v37, %v4241_v19  ;;  %v5069_v21 = vpop.f32.mrb[17].mxu1  ;;  %v4463_v37 = vld [vmem:[%s7419_s2 + $0x68] sm:$0xff] }
 0x262   :  { %v4244_v2 = vpop.f32.mrb[18].mxu1  ;;  %v4512_v12 = vcombine.high %v4463_v37, %v4463_v37 }
 0x263   :  { %v4616_v52 = vadd.f32 %v4460_v28, %v4386_v8  ;;  %v4774_v59 = vcombine.low %v4614_v48, %v4615_v43  ;;  %v4617_v38 = vadd.f32 %v4509_v13, %v4244_v2  ;;  %v5070_v40 = vpop.f32.mrb[19].mxu1  ;;  %v4387_v47 = vcombine.high %v4244_v2, %v4244_v2  ;;  %v4466_v2 = vld [vmem:[%s7419_s2 + $0x80] sm:$0xff] }
 0x264   :  { %v4514_v13 = vcombine.high %v4465_v3, %v4465_v3 }
 0x265   :  { %4871 = vst [vmem:[%s7420_s3 + $0x110] sm:$0xff] %v4774_v59  ;;  %v4775_v29 = vcombine.low %v4616_v52, %v4617_v38  ;;  %v4618_v23 = vadd.f32 %v4461_v31, %v4387_v47  ;;  %v4467_v52 = vld [vmem:[%s7419_s2 + $0x88] sm:$0xff]  ;;  %v4515_v59 = vcombine.high %v4466_v2, %v4466_v2 }
 0x267   :  { %4872 = vst [vmem:[%s7420_s3 + $0x118] sm:$0xff] %v4775_v29 }
 0x26a   :  { %v4153_v36 = vpop.f32.mrb[24].mxu0 }
 0x26b   :  { %v4364_v39 = vcombine.high %v4153_v36, %v4153_v36  ;;  %v5025_v51 = vpop.f32.mrb[25].mxu0  ;;  %v4571_v41 = vadd.f32 %v4462_v60, %v4153_v36 }
 0x26c   :  { %v4156_v9 = vpop.f32.mrb[26].mxu0 }
 0x26d   :  { %v4572_v16 = vadd.f32 %v4511_v30, %v4364_v39  ;;  %v4365_v44 = vcombine.high %v4156_v9, %v4156_v9  ;;  %v5026_v15 = vpop.f32.mrb[27].mxu0  ;;  %v4573_v34 = vadd.f32 %v4463_v37, %v4156_v9 }
 0x26f   :  { %v4753_v5 = vcombine.low %v4571_v41, %v4572_v16  ;;  %v4574_v46 = vadd.f32 %v4512_v12, %v4365_v44 }
 0x271   :  { %4849 = vst [vmem:[%s7420_s3 + $0x60] sm:$0xff] %v4753_v5  ;;  %v4754_v20 = vcombine.low %v4573_v34, %v4574_v46 }
 0x273   :  { %4850 = vst [vmem:[%s7420_s3 + $0x68] sm:$0xff] %v4754_v20 }
 0x275   :  { %v4249_v33 = vpop.f32.mrb[20].mxu1 }
 0x276   :  { %v4388_v14 = vcombine.high %v4249_v33, %v4249_v33  ;;  %v4619_v24 = vadd.f32 %v4510_v7, %v4249_v33  ;;  %v5073_v56 = vpop.f32.mrb[21].mxu1 }
 0x277   :  { %v4252_v57 = vpop.f32.mrb[22].mxu1 }
 0x278   :  { %v4620_v11 = vadd.f32 %v4462_v60, %v4388_v14  ;;  %v4776_v4 = vcombine.low %v4618_v23, %v4619_v24  ;;  %v4621_v1 = vadd.f32 %v4511_v30, %v4252_v57  ;;  %v5074_v35 = vpop.f32.mrb[23].mxu1  ;;  %v4389_v55 = vcombine.high %v4252_v57, %v4252_v57 }
 0x279   :  { %v4516_v60 = vcombine.high %v4467_v52, %v4467_v52 }
 0x27a   :  { %4873 = vst [vmem:[%s7420_s3 + $0x120] sm:$0xff] %v4776_v4  ;;  %v4777_v28 = vcombine.low %v4620_v11, %v4621_v1  ;;  %v4622_v10 = vadd.f32 %v4463_v37, %v4389_v55  ;;  %v4468_v4 = vld [vmem:[%s7419_s2 + $0x90] sm:$0xff]  ;;  %v4469_v1 = vld [vmem:[%s7419_s2 + $0x98] sm:$0xff] }
 0x27b   :  { %v4517_v35 = vcombine.high %v4468_v4, %v4468_v4 }
 0x27c   :  { %4874 = vst [vmem:[%s7420_s3 + $0x128] sm:$0xff] %v4777_v28 }
 0x295   :  { %v4161_v0 = vpop.f32.mrb[28].mxu0 }
 0x296   :  { %v4366_v31 = vcombine.high %v4161_v0, %v4161_v0  ;;  %v5029_v45 = vpop.f32.mrb[29].mxu0  ;;  %v4575_v25 = vadd.f32 %v4464_v22, %v4161_v0 }
 0x297   :  { %v4164_v26 = vpop.f32.mrb[30].mxu0 }
 0x298   :  { %v4576_v62 = vadd.f32 %v4513_v50, %v4366_v31  ;;  %v4367_v7 = vcombine.high %v4164_v26, %v4164_v26  ;;  %v5030_v42 = vpop.f32.mrb[31].mxu0  ;;  %v4577_v63 = vadd.f32 %v4465_v3, %v4164_v26 }
 0x29a   :  { %v4755_v32 = vcombine.low %v4575_v25, %v4576_v62  ;;  %v4578_v18 = vadd.f32 %v4514_v13, %v4367_v7 }
 0x29c   :  { %4851 = vst [vmem:[%s7420_s3 + $0x70] sm:$0xff] %v4755_v32  ;;  %v4756_v53 = vcombine.low %v4577_v63, %v4578_v18 }
 0x29e   :  { %4852 = vst [vmem:[%s7420_s3 + $0x78] sm:$0xff] %v4756_v53  ;;  %v4257_v17 = vpop.f32.mrb[24].mxu1 }
 0x29f   :  { %v4390_v54 = vcombine.high %v4257_v17, %v4257_v17  ;;  %v4623_v49 = vadd.f32 %v4512_v12, %v4257_v17  ;;  %v5077_v61 = vpop.f32.mrb[25].mxu1 }
 0x2a0   :  { %v4260_v6 = vpop.f32.mrb[26].mxu1 }
 0x2a1   :  { %v4624_v19 = vadd.f32 %v4464_v22, %v4390_v54  ;;  %v4778_v48 = vcombine.low %v4622_v10, %v4623_v49  ;;  %v4625_v8 = vadd.f32 %v4513_v50, %v4260_v6  ;;  %v5078_v43 = vpop.f32.mrb[27].mxu1  ;;  %v4391_v44 = vcombine.high %v4260_v6, %v4260_v6  ;;  %v4470_v6 = vld [vmem:[%s7419_s2 + $0xa0] sm:$0xff] }
 0x2a2   :  { %v4518_v50 = vcombine.high %v4469_v1, %v4469_v1 }
 0x2a3   :  { %4875 = vst [vmem:[%s7420_s3 + $0x130] sm:$0xff] %v4778_v48  ;;  %v4779_v21 = vcombine.low %v4624_v19, %v4625_v8  ;;  %v4626_v5 = vadd.f32 %v4465_v3, %v4391_v44  ;;  %v7355_v19 = vld [vmem:[%s7419_s2 + $0xa8] sm:$0xff]  ;;  %v4519_v48 = vcombine.high %v4470_v6, %v4470_v6  ;;  %v4472_v44 = vld [vmem:[%s7419_s2 + $0xb0] sm:$0xff] }
 0x2a5   :  { %4876 = vst [vmem:[%s7420_s3 + $0x138] sm:$0xff] %v4779_v21 }
 0x2af   :  { %v4169_v38 = vpop.f32.mrb[32].mxu0 }
 0x2b0   :  { %v4368_v40 = vcombine.high %v4169_v38, %v4169_v38  ;;  %v5033_v29 = vpop.f32.mrb[33].mxu0  ;;  %v4579_v30 = vadd.f32 %v4466_v2, %v4169_v38 }
 0x2b1   :  { %v4172_v37 = vpop.f32.mrb[34].mxu0 }
 0x2b2   :  { %v4580_v36 = vadd.f32 %v4515_v59, %v4368_v40  ;;  %v4369_v39 = vcombine.high %v4172_v37, %v4172_v37  ;;  %v5034_v51 = vpop.f32.mrb[35].mxu0  ;;  %v4581_v9 = vadd.f32 %v4467_v52, %v4172_v37 }
 0x2b4   :  { %v4757_v12 = vcombine.low %v4579_v30, %v4580_v36  ;;  %v4582_v41 = vadd.f32 %v4516_v60, %v4369_v39 }
 0x2b6   :  { %4853 = vst [vmem:[%s7420_s3 + $0x80] sm:$0xff] %v4757_v12  ;;  %v4758_v16 = vcombine.low %v4581_v9, %v4582_v41 }
 0x2b8   :  { %4854 = vst [vmem:[%s7420_s3 + $0x88] sm:$0xff] %v4758_v16 }
 0x2ba   :  { %v4265_v15 = vpop.f32.mrb[28].mxu1 }
 0x2bb   :  { %v4392_v34 = vcombine.high %v4265_v15, %v4265_v15  ;;  %v4627_v46 = vadd.f32 %v4514_v13, %v4265_v15  ;;  %v5081_v47 = vpop.f32.mrb[29].mxu1 }
 0x2bc   :  { %v4268_v20 = vpop.f32.mrb[30].mxu1 }
 0x2bd   :  { %v4628_v33 = vadd.f32 %v4466_v2, %v4392_v34  ;;  %v4780_v23 = vcombine.low %v4626_v5, %v4627_v46  ;;  %v4393_v14 = vcombine.high %v4268_v20, %v4268_v20  ;;  %v4629_v24 = vadd.f32 %v4515_v59, %v4268_v20  ;;  %v5082_v56 = vpop.f32.mrb[31].mxu1  ;;  %v4473_v20 = vld [vmem:[%s7419_s2 + $0xb8] sm:$0xff] }
 0x2be   :  { %v4520_v2 = vcombine.high %v7355_v19, %v7355_v19 }
 0x2bf   :  { %4877 = vst [vmem:[%s7420_s3 + $0x140] sm:$0xff] %v4780_v23  ;;  %v4630_v57 = vadd.f32 %v4467_v52, %v4393_v14  ;;  %v4781_v11 = vcombine.low %v4628_v33, %v4629_v24  ;;  %v4521_v33 = vcombine.high %v4472_v44, %v4472_v44 }
 0x2c1   :  { %4878 = vst [vmem:[%s7420_s3 + $0x148] sm:$0xff] %v4781_v11 }
 0x2cf   :  { %v4177_v28 = vpop.f32.mrb[36].mxu0 }
 0x2d0   :  { %v4370_v22 = vcombine.high %v4177_v28, %v4177_v28  ;;  %v5037_v3 = vpop.f32.mrb[37].mxu0  ;;  %v4583_v31 = vadd.f32 %v4468_v4, %v4177_v28 }
 0x2d1   :  { %v4180_v0 = vpop.f32.mrb[38].mxu0 }
 0x2d2   :  { %v4584_v45 = vadd.f32 %v4517_v35, %v4370_v22  ;;  %v4371_v13 = vcombine.high %v4180_v0, %v4180_v0  ;;  %v5038_v26 = vpop.f32.mrb[39].mxu0  ;;  %v4585_v62 = vadd.f32 %v4469_v1, %v4180_v0  ;;  %v4474_v0 = vld [vmem:[%s7419_s2 + $0xc0] sm:$0xf] }
 0x2d4   :  { %v4759_v25 = vcombine.low %v4583_v31, %v4584_v45  ;;  %v4586_v7 = vadd.f32 %v4518_v50, %v4371_v13 }
 0x2d6   :  { %4855 = vst [vmem:[%s7420_s3 + $0x90] sm:$0xff] %v4759_v25  ;;  %v4760_v42 = vcombine.low %v4585_v62, %v4586_v7 }
 0x2d8   :  { %4856 = vst [vmem:[%s7420_s3 + $0x98] sm:$0xff] %v4760_v42  ;;  %v5204_v42 = vld [vmem:[%s7419_s2] sm:$0xff] }
 0x2ee   :  { %v4273_v32 = vpop.f32.mrb[32].mxu1 }
 0x2ef   :  { %v4394_v63 = vcombine.high %v4273_v32, %v4273_v32  ;;  %v4631_v18 = vadd.f32 %v4516_v60, %v4273_v32  ;;  %v5085_v55 = vpop.f32.mrb[33].mxu1 }
 0x2f0   :  { %v4276_v53 = vpop.f32.mrb[34].mxu1 }
 0x2f1   :  { %v4632_v17 = vadd.f32 %v4468_v4, %v4394_v63  ;;  %v4782_v10 = vcombine.low %v4630_v57, %v4631_v18  ;;  %v4633_v54 = vadd.f32 %v4517_v35, %v4276_v53  ;;  %v5086_v49 = vpop.f32.mrb[35].mxu1  ;;  %v4395_v39 = vcombine.high %v4276_v53, %v4276_v53 }
 0x2f2   :  { %v4522_v57 = vcombine.high %v4473_v20, %v4473_v20 }
 0x2f3   :  { %4879 = vst [vmem:[%s7420_s3 + $0x150] sm:$0xff] %v4782_v10  ;;  %v4783_v61 = vcombine.low %v4632_v17, %v4633_v54  ;;  %v4634_v12 = vadd.f32 %v4469_v1, %v4395_v39 }
 0x2f5   :  { %4880 = vst [vmem:[%s7420_s3 + $0x158] sm:$0xff] %v4783_v61  ;;  %v5205_v61 = vld [vmem:[%s7419_s2 + $0x8] sm:$0xff] }
 0x2f7   :  { %v4185_v8 = vpop.f32.mrb[40].mxu0 }
 0x2f8   :  { %v4372_v43 = vcombine.high %v4185_v8, %v4185_v8  ;;  %v5041_v21 = vpop.f32.mrb[41].mxu0  ;;  %v4587_v59 = vadd.f32 %v4470_v6, %v4185_v8 }
 0x2f9   :  { %v4188_v52 = vpop.f32.mrb[42].mxu0 }
 0x2fa   :  { %v4588_v38 = vadd.f32 %v4519_v48, %v4372_v43  ;;  %v4373_v40 = vcombine.high %v4188_v52, %v4188_v52  ;;  %v5042_v29 = vpop.f32.mrb[43].mxu0  ;;  %v4589_v37 = vadd.f32 %v7355_v19, %v4188_v52 }
 0x2fc   :  { %v4761_v60 = vcombine.low %v4587_v59, %v4588_v38  ;;  %v4590_v30 = vadd.f32 %v4520_v2, %v4373_v40 }
 0x2fe   :  { %4857 = vst [vmem:[%s7420_s3 + $0xa0] sm:$0xff] %v4761_v60  ;;  %v4762_v36 = vcombine.low %v4589_v37, %v4590_v30 }
 0x300   :  { %4858 = vst [vmem:[%s7420_s3 + $0xa8] sm:$0xff] %v4762_v36 }
 0x30c   :  { %v4281_v51 = vpop.f32.mrb[36].mxu1 }
 0x30d   :  { %v4396_v9 = vcombine.high %v4281_v51, %v4281_v51  ;;  %v4635_v41 = vadd.f32 %v4518_v50, %v4281_v51  ;;  %v5089_v16 = vpop.f32.mrb[37].mxu1 }
 0x30e   :  { %v4284_v15 = vpop.f32.mrb[38].mxu1 }
 0x30f   :  { %v4636_v5 = vadd.f32 %v4470_v6, %v4396_v9  ;;  %v4784_v34 = vcombine.low %v4634_v12, %v4635_v41  ;;  %v4637_v46 = vadd.f32 %v4519_v48, %v4284_v15  ;;  %v5090_v47 = vpop.f32.mrb[39].mxu1  ;;  %v4397_v45 = vcombine.high %v4284_v15, %v4284_v15 }
 0x311   :  { %4881 = vst [vmem:[%s7420_s3 + $0x160] sm:$0xff] %v4784_v34  ;;  %v4785_v23 = vcombine.low %v4636_v5, %v4637_v46  ;;  %v4638_v17 = vadd.f32 %v7355_v19, %v4397_v45 }
 0x312   :  { %v4193_v14 = vpop.f32.mrb[44].mxu0 }
 0x313   :  { %v4374_v24 = vcombine.high %v4193_v14, %v4193_v14  ;;  %v5045_v56 = vpop.f32.mrb[45].mxu0  ;;  %4882 = vst [vmem:[%s7420_s3 + $0x168] sm:$0xff] %v4785_v23  ;;  %v4591_v4 = vadd.f32 %v4472_v44, %v4193_v14 }
 0x314   :  { %v4196_v11 = vpop.f32.mrb[46].mxu0 }
 0x315   :  { %v4592_v1 = vadd.f32 %v4521_v33, %v4374_v24  ;;  %v4375_v35 = vcombine.high %v4196_v11, %v4196_v11  ;;  %v5046_v28 = vpop.f32.mrb[47].mxu0  ;;  %v4593_v3 = vadd.f32 %v4473_v20, %v4196_v11 }
 0x317   :  { %v4763_v22 = vcombine.low %v4591_v4, %v4592_v1  ;;  %v4594_v50 = vadd.f32 %v4522_v57, %v4375_v35 }
 0x319   :  { %4859 = vst [vmem:[%s7420_s3 + $0xb0] sm:$0xff] %v4763_v22  ;;  %v4764_v31 = vcombine.low %v4593_v3, %v4594_v50 }
 0x31a   :  { %v4201_v13 = vpop.f32.mrb[48].mxu0 }
 0x31b   :  { %4860 = vst [vmem:[%s7420_s3 + $0xb8] sm:$0xff] %v4764_v31  ;;  %v4376_v26 = vcombine.high %v4201_v13, %v4201_v13  ;;  %v4595_v25 = vadd.f32 %v4474_v0, %v4201_v13  ;;  %v5049_v62 = vpop.f32.mrb[49].mxu0 }
 0x31c   :  { %v4204_v7 = vpop.f32.mrb[50].mxu0 }
 0x31d   :  { %v4596_v32 = vadd.f32 %v5204_v42, %v4376_v26  ;;  %4861 = vst [vmem:[%s7420_s3 + $0xc0] sm:$0xf] %v4595_v25  ;;  %v4377_v63 = vcombine.high %v4204_v7, %v4204_v7  ;;  %v4597_v18 = vadd.f32 %v6603_v58, %v4204_v7  ;;  %v5050_v55 = vpop.f32.mrb[51].mxu0  ;;  %v4289_v53 = vpop.f32.mrb[40].mxu1 }
 0x31e   :  { %v4398_v10 = vcombine.high %v4289_v53, %v4289_v53  ;;  %v4639_v54 = vadd.f32 %v4520_v2, %v4289_v53  ;;  %v5093_v49 = vpop.f32.mrb[41].mxu1 }
 0x31f   :  { %v4598_v6 = vadd.f32 %v5205_v61, %v4377_v63  ;;  %v4765_v48 = vcombine.low %v4596_v32, %v4597_v18  ;;  %v4292_v8 = vpop.f32.mrb[42].mxu1 }
 0x320   :  { %v4640_v43 = vadd.f32 %v4472_v44, %v4398_v10  ;;  %v4786_v21 = vcombine.low %v4638_v17, %v4639_v54  ;;  %v4641_v52 = vadd.f32 %v4521_v33, %v4292_v8  ;;  %v5094_v59 = vpop.f32.mrb[43].mxu1  ;;  %v4399_v19 = vcombine.high %v4292_v8, %v4292_v8 }
 0x321   :  { %v4766_v58 = vcombine.low %v4598_v6, %v6834_v27  ;;  %4862 = vst [vmem:[%s7420_s3 + $0xc8] sm:$0xff] %v4765_v48 }
 0x322   :  { %4883 = vst [vmem:[%s7420_s3 + $0x170] sm:$0xff] %v4786_v21  ;;  %v4787_v2 = vcombine.low %v4640_v43, %v4641_v52  ;;  %v4642_v27 = vadd.f32 %v4473_v20, %v4399_v19 }
 0x323   :  { %4863 = vst [vmem:[%s7420_s3 + $0xd0] sm:$0xff] %v4766_v58 }
 0x324   :  { %4884 = vst [vmem:[%s7420_s3 + $0x178] sm:$0xff] %v4787_v2 }
 0x325   :  { %v4297_v38 = vpop.f32.mrb[44].mxu1 }
 0x326   :  { %v4400_v40 = vcombine.high %v4297_v38, %v4297_v38  ;;  %v4643_v29 = vadd.f32 %v4522_v57, %v4297_v38  ;;  %v5097_v60 = vpop.f32.mrb[45].mxu1 }
 0x327   :  { %v4300_v37 = vpop.f32.mrb[46].mxu1 }
 0x328   :  { %v4644_v30 = vadd.f32 %v4474_v0, %v4400_v40  ;;  %v4788_v36 = vcombine.low %v4642_v27, %v4643_v29  ;;  %v5098_v39 = vpop.f32.mrb[47].mxu1 }
 0x32a   :  { %4885 = vst [vmem:[%s7420_s3 + $0x180] sm:$0xff] %v4788_v36  ;;  %4886 = vst [vmem:[%s7420_s3 + $0x188] sm:$0xf] %v4644_v30 }

</bundles_post_ra>
